<compile_context>
chip_gen: v6e
topology: v6e:2x2x1
jax: 0.10.0
libtpu: 0.0.40
codegen_flags: <defaults>
</compile_context>

<pallas_src>
import numpy as np
import jax
import jax.numpy as jnp
from jax import lax
from jax.experimental import pallas as pl
from jax.experimental.pallas import tpu as pltpu

N_BINS = 15
LANES = 128                      # bin axis padded to a full lane width
CH = 256                         # rows per in-kernel compute chunk
_VMEM_BUDGET = 24 * 1024 * 1024  # target for double-buffered logits stream
_VMEM_LIMIT = 48 * 1024 * 1024   # scoped VMEM limit (safe on v5e/v6e/v7x)
_MAX_TILE_ROWS = 32768


def _round_up(x, m):
    return ((x + m - 1) // m) * m


def _make_ece_kernel(n_total, tile_n, blocks_per_core):
    cpb = tile_n // CH
    n_bins_f = np.float32(N_BINS)

    def kernel(logits_ref, labels_ref, out_ref, eye_ref):
        core = pl.program_id(0)
        j = pl.program_id(1)
        n_cls = logits_ref.shape[1]

        @pl.when(j == 0)
        def _init():
            out_ref[...] = jnp.zeros_like(out_ref)
            r = lax.broadcasted_iota(jnp.int32, (CH, CH), 0)
            c = lax.broadcasted_iota(jnp.int32, (CH, CH), 1)
            eye_ref[...] = (r == c).astype(jnp.float32)

        # Logical (unclamped) block id -> global row offset.  Phantom blocks
        # (past the end of the data) contribute nothing via the valid mask.
        row0 = (core * blocks_per_core + j) * tile_n

        # Bin boundaries (lo, hi] on the lane axis; lanes >= N_BINS can never
        # match a confidence in (0, 1].
        lane = lax.broadcasted_iota(jnp.int32, (1, LANES), 1).astype(jnp.float32)
        lo = lane / n_bins_f
        hi = (lane + 1.0) / n_bins_f

        col = lax.broadcasted_iota(jnp.int32, (CH, n_cls), 1).astype(jnp.float32)
        local_row = lax.broadcasted_iota(jnp.int32, (CH, 1), 0)
        eye = eye_ref[...]

        def chunk(ch, carry):
            off = pl.multiple_of(ch * CH, CH)
            x = logits_ref[pl.ds(off, CH), :].astype(jnp.float32)      # (CH, C)

            # conf = max(softmax) = 1 / sum(exp(x - max)); pred = first argmax.
            row_max = jnp.max(x, axis=1, keepdims=True)
            denom = jnp.sum(jnp.exp(x - row_max), axis=1, keepdims=True)
            conf = 1.0 / denom                                          # (CH, 1)
            pred = jnp.min(jnp.where(x == row_max, col, float(n_cls)),
                           axis=1, keepdims=True)                       # (CH, 1)

            # Lane-dense labels row -> per-row column via a tiny MXU matmul.
            lab_row = labels_ref[pl.ds(ch, 1)].reshape(1, CH)           # (1, CH)
            lab_col = lax.dot_general(
                eye, lab_row, (((1,), (1,)), ((), ())),
                preferred_element_type=jnp.float32,
                precision=lax.Precision.HIGHEST)                        # (CH, 1)
            correct = (pred == lab_col).astype(jnp.float32)             # (CH, 1)

            # Rows past the end of the data: push their confidence outside
            # every bin (also squashes NaNs from uninitialized tail rows).
            valid = (row0 + off + local_row) < n_total
            conf = jnp.where(valid, conf, -1.0)

            in_bin = jnp.logical_and(conf > lo, conf <= hi)
            in_bin = in_bin.astype(jnp.float32)                         # (CH, 128)

            # conf split into a bf16-exact hi part + residual so the MXU
            # histogram reduction is f32-exact at any input precision.
            conf_hi = conf.astype(jnp.bfloat16).astype(jnp.float32)
            conf_lo = conf - conf_hi
            stacked = jnp.concatenate([conf_hi, conf_lo, correct], axis=1)  # (CH, 3)

            # Per-bin partial sums on the MXU: (CH, 3)^T x (CH, 128) -> (3, 128).
            part = lax.dot_general(
                stacked, in_bin, (((0,), (0,)), ((), ())),
                preferred_element_type=jnp.float32)
            return carry + part

        carry = lax.fori_loop(0, cpb, chunk, jnp.zeros((3, LANES), jnp.float32))
        out_ref[...] += carry.reshape(1, 3, LANES)

    return kernel


def ece_loss(logits: jax.Array, labels: jax.Array, *, max_tile_rows=None) -> jax.Array:
    """logits: (N, C) float (f32 or bf16, not pre-upcast); labels: (N,) int.

    Returns a shape-(1,) float32 ECE, matching the PyTorch module.
    """
    n, c = logits.shape
    itemsize = jnp.dtype(logits.dtype).itemsize

    # --- VMEM-budget-driven row-tile size (double-buffered logits stream). ---
    per_row = 2 * c * itemsize + 2 * 4 + 64       # logits x2, labels x2, slack
    tile_n = _VMEM_BUDGET // per_row
    tile_n = min(tile_n, _MAX_TILE_ROWS, _round_up(n, CH))
    if max_tile_rows is not None:
        tile_n = min(tile_n, max_tile_rows)
    tile_n = max(CH, (tile_n // CH) * CH)          # multiple of the compute chunk

    n_blocks = pl.cdiv(n, tile_n)
    blocks_per_core = pl.cdiv(n_blocks, 2)         # 2 row halves: v7x megacore
    cpb = tile_n // CH

    # Lane-dense labels: pad to the padded row count and pack so that every
    # 256-row compute chunk is one dense (1, 256) row.
    labels_f = labels.astype(jnp.float32)
    labels_f = jnp.pad(labels_f, (0, n_blocks * tile_n - n))
    labels_packed = labels_f.reshape(n_blocks * cpb, 1, CH)

    def block_idx(core, j):
        return jnp.minimum(core * blocks_per_core + j, n_blocks - 1)

    kernel = _make_ece_kernel(n, tile_n, blocks_per_core)

    parts = pl.pallas_call(
        kernel,
        out_shape=jax.ShapeDtypeStruct((2, 3, LANES), jnp.float32),
        grid_spec=pltpu.PrefetchScalarGridSpec(
            num_scalar_prefetch=0,
            grid=(2, blocks_per_core),
            in_specs=[
                pl.BlockSpec((tile_n, c), lambda core, j: (block_idx(core, j), 0)),
                pl.BlockSpec((cpb, 1, CH),
                             lambda core, j: (block_idx(core, j), 0, 0)),
            ],
            out_specs=pl.BlockSpec((1, 3, LANES), lambda core, j: (core, 0, 0)),
            scratch_shapes=[pltpu.VMEM((CH, CH), jnp.float32)],
        ),
        compiler_params=pltpu.CompilerParams(
            dimension_semantics=("parallel", "arbitrary"),
            vmem_limit_bytes=_VMEM_LIMIT),
    )(logits, labels_packed)

    sums = jnp.sum(parts, axis=0)                  # combine the two core slices
    conf_sums = sums[0] + sums[1]                  # re-join the hi/lo conf split
    corr_sums = sums[2]
    # Empty / padded bins have conf_sum == acc_sum == 0 -> contribute 0,
    # matching the PyTorch `if prop_in_bin.item() > 0` branch.
    ece = jnp.sum(jnp.abs(conf_sums - corr_sums)) / np.float32(n)
    return ece.reshape(1)


def _ece_reference(logits, labels):
    """Pure-JAX reference mirroring the PyTorch loop semantics."""
    sm = jax.nn.softmax(logits.astype(jnp.float32), axis=1)
    conf = jnp.max(sm, axis=1)
    pred = jnp.argmax(sm, axis=1)
    acc = (pred == labels).astype(jnp.float32)
    n = conf.shape[0]
    bb = np.linspace(0.0, 1.0, N_BINS + 1).astype(np.float32)
    ece = jnp.zeros((1,), jnp.float32)
    for b in range(N_BINS):
        lo, hi = bb[b], bb[b + 1]
        in_bin = jnp.logical_and(conf > lo, conf <= hi).astype(jnp.float32)
        cnt = jnp.sum(in_bin)
        conf_sum = jnp.sum(conf * in_bin)
        acc_sum = jnp.sum(acc * in_bin)
        contrib = jnp.where(cnt > 0, jnp.abs(conf_sum - acc_sum) / n, 0.0)
        ece = ece + contrib
    return ece


if __name__ == "__main__":
    key = jax.random.PRNGKey(0)
    k_logits, k_labels = jax.random.split(key)
    # Small, deliberately awkward sizes: N is not a multiple of the row tile,
    # so the run exercises multi-block accumulation, the partial last block,
    # a phantom block on the second core slice, and in-block chunking.
    N, C = 1500, 16
    logits = jax.random.normal(k_logits, (N, C), dtype=jnp.float32) * 3.0
    labels = jax.random.randint(k_labels, (N,), 0, C, dtype=jnp.int32)

    ece = jax.block_until_ready(ece_loss(logits, labels, max_tile_rows=512))
    ref = jax.block_until_ready(_ece_reference(logits, labels))

    assert ece.shape == (1,)
    np.testing.assert_allclose(np.asarray(ece), np.asarray(ref), rtol=1e-5, atol=1e-6)
    print("KERNEL_OK")
</pallas_src>

<mosaic_0001>
module attributes {stable_mosaic.version = 11 : i64} {
  func.func @kernel(%arg0: i32, %arg1: i32, %arg2: memref<512x16xf32, #tpu.memory_space<vmem>>, %arg3: memref<2x1x256xf32, #tpu.memory_space<vmem>>, %arg4: memref<1x3x128xf32, #tpu.memory_space<vmem>>, %arg5: memref<256x256xf32, #tpu.memory_space<vmem>>) attributes {dimension_semantics = [#tpu.dimension_semantics<parallel>, #tpu.dimension_semantics<arbitrary>], iteration_bounds = array<i64: 2, 2>, scalar_prefetch = 0 : i64, scratch_operands = 1 : i64, tpu.core_type = #tpu.core_type<tc>, window_params = [{transform_indices = @transform_0, window_bounds = array<i64: 512, 16>}, {transform_indices = @transform_1, window_bounds = array<i64: 2, 1, 256>}, {transform_indices = @transform_2, window_bounds = array<i64: 1, 3, 128>}]} {
    %c0_i32 = arith.constant 0 : i32
    %0 = arith.cmpi eq, %arg1, %c0_i32 : i32
    %1 = arith.extui %0 : i1 to i32
    %c0_i32_0 = arith.constant 0 : i32
    %2 = arith.cmpi ne, %1, %c0_i32_0 : i32
    scf.if %2 {
      %cst_14 = arith.constant 0.000000e+00 : f32
      %25 = vector.broadcast %cst_14 : f32 to vector<1x3x128xf32>
      %c0_15 = arith.constant 0 : index
      %c0_16 = arith.constant 0 : index
      %c0_17 = arith.constant 0 : index
      %26 = vector.load %arg4[%c0_15, %c0_16, %c0_17] : memref<1x3x128xf32, #tpu.memory_space<vmem>>, vector<1x3x128xf32>
      tpu.vector_store %arg4[%c0_15, %c0_16, %c0_17], %25 {strides = array<i32>} : memref<1x3x128xf32, #tpu.memory_space<vmem>>, vector<1x3x128xf32>,
      %27 = tpu.iota {dimensions = array<i32: 0>} : vector<256x256xi32>
      %28 = tpu.iota {dimensions = array<i32: 1>} : vector<256x256xi32>
      %29 = arith.cmpi eq, %27, %28 : vector<256x256xi32>
      %30 = arith.extui %29 : vector<256x256xi1> to vector<256x256xi32>
      %31 = arith.sitofp %30 : vector<256x256xi32> to vector<256x256xf32>
      %c0_18 = arith.constant 0 : index
      %c0_19 = arith.constant 0 : index
      %32 = vector.load %arg5[%c0_18, %c0_19] : memref<256x256xf32, #tpu.memory_space<vmem>>, vector<256x256xf32>
      tpu.vector_store %arg5[%c0_18, %c0_19], %31 {strides = array<i32>} : memref<256x256xf32, #tpu.memory_space<vmem>>, vector<256x256xf32>,
    } else {
    }
    %c2_i32 = arith.constant 2 : i32
    %3 = arith.muli %arg0, %c2_i32 : i32
    %4 = arith.addi %3, %arg1 : i32
    %c512_i32 = arith.constant 512 : i32
    %5 = arith.muli %4, %c512_i32 : i32
    %6 = tpu.iota {dimensions = array<i32: 1>} : vector<1x128xi32>
    %7 = arith.sitofp %6 : vector<1x128xi32> to vector<1x128xf32>
    %cst = arith.constant 1.500000e+01 : f32
    %8 = vector.broadcast %cst : f32 to vector<1x128xf32>
    %9 = arith.divf %7, %8 : vector<1x128xf32>
    %cst_1 = arith.constant 1.000000e+00 : f32
    %10 = vector.broadcast %cst_1 : f32 to vector<1x128xf32>
    %11 = arith.addf %7, %10 : vector<1x128xf32>
    %cst_2 = arith.constant 1.500000e+01 : f32
    %12 = vector.broadcast %cst_2 : f32 to vector<1x128xf32>
    %13 = arith.divf %11, %12 : vector<1x128xf32>
    %14 = tpu.iota {dimensions = array<i32: 1>} : vector<256x16xi32>
    %15 = arith.sitofp %14 : vector<256x16xi32> to vector<256x16xf32>
    %16 = tpu.iota {dimensions = array<i32: 0>} : vector<256x1xi32>
    %c0 = arith.constant 0 : index
    %c0_3 = arith.constant 0 : index
    %17 = vector.load %arg5[%c0, %c0_3] : memref<256x256xf32, #tpu.memory_space<vmem>>, vector<256x256xf32>
    %cst_4 = arith.constant 0.000000e+00 : f32
    %18 = vector.broadcast %cst_4 : f32 to vector<3x128xf32>
    %c0_i32_5 = arith.constant 0 : i32
    %c2_i32_6 = arith.constant 2 : i32
    %19 = arith.addi %c0_i32_5, %c2_i32_6 : i32
    %c1_i32 = arith.constant 1 : i32
    %20 = scf.for %arg6 = %c0_i32_5 to %19 step %c1_i32 iter_args(%arg7 = %18) -> (vector<3x128xf32>)  : i32 {
      %c256_i32 = arith.constant 256 : i32
      %25 = arith.muli %arg6, %c256_i32 : i32
      %26 = tpu.assume_multiple %25, 256 : i32
      %27 = arith.index_cast %26 : i32 to index
      %c0_14 = arith.constant 0 : index
      %28 = vector.load %arg2[%27, %c0_14] : memref<512x16xf32, #tpu.memory_space<vmem>>, vector<256x16xf32>
      %cst_15 = arith.constant dense<0xFF800000> : vector<256xf32>
      %29 = vector.multi_reduction <maximumf>, %28, %cst_15 [1] : vector<256x16xf32> to vector<256xf32>
      %30 = vector.shape_cast %29 : vector<256xf32> to vector<256x1xf32>
      %31 = vector.broadcast %30 : vector<256x1xf32> to vector<256x16xf32>
      %32 = arith.subf %28, %31 : vector<256x16xf32>
      %33 = math.exp %32 : vector<256x16xf32>
      %cst_16 = arith.constant dense<0.000000e+00> : vector<256xf32>
      %34 = vector.multi_reduction <add>, %33, %cst_16 [1] : vector<256x16xf32> to vector<256xf32>
      %35 = vector.shape_cast %34 : vector<256xf32> to vector<256x1xf32>
      %cst_17 = arith.constant 1.000000e+00 : f32
      %36 = vector.broadcast %cst_17 : f32 to vector<256x1xf32>
      %37 = arith.divf %36, %35 : vector<256x1xf32>
      %38 = vector.broadcast %30 : vector<256x1xf32> to vector<256x16xf32>
      %39 = arith.cmpf oeq, %28, %38 : vector<256x16xf32>
      %cst_18 = arith.constant 1.600000e+01 : f32
      %40 = vector.broadcast %cst_18 : f32 to vector<256x16xf32>
      %41 = arith.select %39, %15, %40 : vector<256x16xi1>, vector<256x16xf32>
      %cst_19 = arith.constant dense<0x7F800000> : vector<256xf32>
      %42 = vector.multi_reduction <minimumf>, %41, %cst_19 [1] : vector<256x16xf32> to vector<256xf32>
      %43 = vector.shape_cast %42 : vector<256xf32> to vector<256x1xf32>
      %44 = arith.index_cast %arg6 : i32 to index
      %c0_20 = arith.constant 0 : index
      %c0_21 = arith.constant 0 : index
      %45 = vector.load %arg3[%44, %c0_20, %c0_21] : memref<2x1x256xf32, #tpu.memory_space<vmem>>, vector<1x1x256xf32>
      %46 = vector.shape_cast %45 : vector<1x1x256xf32> to vector<1x256xf32>
      %cst_22 = arith.constant dense<0.000000e+00> : vector<256x1xf32>
      %47 = tpu.matmul %17, %46, %cst_22 {dimension_numbers = #tpu.dot_dimension_numbers<[1], [1], [0], [0], [0, 0, 1, 0], [], []>, precision = #tpu.contract_precision<fp32>} : vector<256x256xf32>, vector<1x256xf32>, vector<256x1xf32> -> vector<256x1xf32>
      %48 = arith.cmpf oeq, %43, %47 : vector<256x1xf32>
      %49 = arith.extui %48 : vector<256x1xi1> to vector<256x1xi32>
      %50 = arith.sitofp %49 : vector<256x1xi32> to vector<256x1xf32>
      %51 = arith.addi %5, %26 : i32
      %52 = vector.broadcast %51 : i32 to vector<256x1xi32>
      %53 = arith.addi %52, %16 : vector<256x1xi32>
      %c1500_i32 = arith.constant 1500 : i32
      %54 = vector.broadcast %c1500_i32 : i32 to vector<256x1xi32>
      %55 = arith.cmpi slt, %53, %54 : vector<256x1xi32>
      %cst_23 = arith.constant -1.000000e+00 : f32
      %56 = vector.broadcast %cst_23 : f32 to vector<256x1xf32>
      %57 = arith.select %55, %37, %56 : vector<256x1xi1>, vector<256x1xf32>
      %58 = vector.broadcast %57 : vector<256x1xf32> to vector<256x128xf32>
      %59 = vector.broadcast %9 : vector<1x128xf32> to vector<256x128xf32>
      %60 = arith.cmpf ogt, %58, %59 : vector<256x128xf32>
      %61 = vector.broadcast %57 : vector<256x1xf32> to vector<256x128xf32>
      %62 = vector.broadcast %13 : vector<1x128xf32> to vector<256x128xf32>
      %63 = arith.cmpf ole, %61, %62 : vector<256x128xf32>
      %64 = arith.andi %60, %63 : vector<256x128xi1>
      %65 = arith.extui %64 : vector<256x128xi1> to vector<256x128xi32>
      %66 = arith.sitofp %65 : vector<256x128xi32> to vector<256x128xf32>
      %67 = arith.truncf %57 : vector<256x1xf32> to vector<256x1xbf16>
      %68 = arith.extf %67 : vector<256x1xbf16> to vector<256x1xf32>
      %69 = arith.subf %57, %68 : vector<256x1xf32>
      %70 = tpu.concatenate %68, %69, %50 in 1 : vector<256x1xf32>, vector<256x1xf32>, vector<256x1xf32> -> vector<256x3xf32>
      %cst_24 = arith.constant dense<0.000000e+00> : vector<3x128xf32>
      %71 = tpu.matmul %70, %66, %cst_24 {dimension_numbers = #tpu.dot_dimension_numbers<[0], [0], [1], [1], [0, 1, 1, 1], [], []>} : vector<256x3xf32>, vector<256x128xf32>, vector<3x128xf32> -> vector<3x128xf32>
      %72 = arith.addf %arg7, %71 : vector<3x128xf32>
      scf.yield %72 : vector<3x128xf32>
    }
    %c2_i32_7 = arith.constant 2 : i32
    %c0_8 = arith.constant 0 : index
    %c0_9 = arith.constant 0 : index
    %c0_10 = arith.constant 0 : index
    %21 = vector.load %arg4[%c0_8, %c0_9, %c0_10] : memref<1x3x128xf32, #tpu.memory_space<vmem>>, vector<1x3x128xf32>
    %22 = vector.shape_cast %20 : vector<3x128xf32> to vector<1x3x128xf32>
    %23 = arith.addf %21, %22 : vector<1x3x128xf32>
    %c0_11 = arith.constant 0 : index
    %c0_12 = arith.constant 0 : index
    %c0_13 = arith.constant 0 : index
    %24 = vector.load %arg4[%c0_11, %c0_12, %c0_13] : memref<1x3x128xf32, #tpu.memory_space<vmem>>, vector<1x3x128xf32>
    tpu.vector_store %arg4[%c0_11, %c0_12, %c0_13], %23 {strides = array<i32>} : memref<1x3x128xf32, #tpu.memory_space<vmem>>, vector<1x3x128xf32>,
    return
  }
  func.func @transform_0(%arg0: i32, %arg1: i32) -> (i32, i32) {
    %c2_i32 = arith.constant 2 : i32
    %0 = arith.muli %arg0, %c2_i32 : i32
    %1 = arith.addi %0, %arg1 : i32
    %c2_i32_0 = arith.constant 2 : i32
    %2 = arith.minsi %1, %c2_i32_0 : i32
    %c0_i32 = arith.constant 0 : i32
    %c0_i32_1 = arith.constant 0 : i32
    return %2, %c0_i32 : i32, i32
  }
  func.func @transform_1(%arg0: i32, %arg1: i32) -> (i32, i32, i32) {
    %c2_i32 = arith.constant 2 : i32
    %0 = arith.muli %arg0, %c2_i32 : i32
    %1 = arith.addi %0, %arg1 : i32
    %c2_i32_0 = arith.constant 2 : i32
    %2 = arith.minsi %1, %c2_i32_0 : i32
    %c0_i32 = arith.constant 0 : i32
    %c0_i32_1 = arith.constant 0 : i32
    %c0_i32_2 = arith.constant 0 : i32
    return %2, %c0_i32, %c0_i32_1 : i32, i32, i32
  }
  func.func @transform_2(%arg0: i32, %arg1: i32) -> (i32, i32, i32) {
    %c0_i32 = arith.constant 0 : i32
    %c0_i32_0 = arith.constant 0 : i32
    %c0_i32_1 = arith.constant 0 : i32
    return %arg0, %c0_i32, %c0_i32_0 : i32, i32, i32
  }
}

</mosaic_0001>

<bundles_post_ra>
// kernel: tpu_custom_call.1
= control target key start
LH: loop header
LB: loop body
LE: loop exit
PB: predicated region body
PF: predicated region fallthrough
CT: control target
= control target key end

     0   :  { %s2598_s9 = smov 0   ;;  %s2600_s10 = smov 0   ;;  %s4563_s0 = inlined_call_operand.vmem [shape: f32[1500,16], index: 0, kind: input, shape index: {}]   ;;  %s4564_s1 = inlined_call_operand.vmem [shape: f32[6,1,256], index: 1, kind: input, shape index: {}]   ;;  %s4565_s2 = inlined_call_operand.vmem [shape: f32[2,3,128], index: 2, kind: output, shape index: {}]  }
   0x1   :  { %s2602_s11 = smov 0   ;;  %s2604_s12 = smov 0  }
   0x2   :  { %s2606_s13 = smov 0  }
   0x3 LB: > { %s21_s14 = sadd.s32 1, %s2562_s11  ;;  %s24_s15 = sadd.s32 1, %s2566_s12  ;;  %s2570_s13 = sphi %s2606_s13, %s12_s13   ;;  %s2566_s12 = sphi %s2604_s12, %s4841_s12   ;;  %s2562_s11 = sphi %s2602_s11, %s4840_s11   ;;  %s2558_s10 = sphi %s2600_s10, %s4839_s10   ;;  %s2554_s9 = sphi %s2598_s9, %s4838_s9  }
   0x4   : > { %p22_p0 = scmp.ge.s32.totalorder %s21_s14, 2  ;;  %p2120_p1 = scmp.ge.s32.totalorder %s2570_s13, 1 }
   0x5   : > { %p176_p2 = scmp.lt.s32.totalorder %s2570_s13, 5 }
   0x6   : > { %s4843_s14 = smov (%p22_p0, %s21_s14), 0  ;;  %s4845_s15 = smov (!%p22_p0, %s24_s15), %s2566_s12 }
   0x7   : > { %p177_p3 = pnand %p2120_p1, %p176_p2  ;;  %p26_p4 = scmp.ge.s32.totalorder %s4845_s15, 2 }
   0x9   : > { %s4847_s15 = smov (%p26_p4, %s4845_s15), 0  ;;  %180 = sbr.rel (%p177_p3) target bundleno = 858 (0x35a), region = 28 }
   0xe   : > { %s2121_s16 = sshll.u32 %s2558_s10, 1  ;;  %p250_p5 = scmp.lt.s32.totalorder %s2558_s10, 1 }
   0xf   : > { %s2631_s17 = sadd.s32 %s2554_s9, %s2121_s16  ;;  %p2128_p9 = scmp.ne.s32.totalorder %s2554_s9, 0 }
  0x10   : > { %p216_p6 = scmp.lt.s32.totalorder %s2631_s17, 2  ;;  %s4849_s10 = smov (!%p250_p5, %s2558_s10), 1 }
  0x11   : > { %s2127_s19 = sshll.u32 %s4849_s10, 2 }
  0x12   : > { %s217_s18 = scalar_select %p216_p6, %s2631_s17, 2 }
  0x13   : > { %s2638_s24 = scalar_lea.vmem %s4565_s2, %s2127_s19 }
  0x14   : > { %s2122_s20 = sshll.u32 %s217_s18, 6  ;;  %s2125_s21 = sshll.u32 %s217_s18, 1 }
  0x15   : > { %p223_p7 = scmp.lt.s32.totalorder %s2122_s20, 187  ;;  %p241_p8 = scmp.lt.s32.totalorder %s2125_s21, 5 }
  0x16   : > { %257 = sbr.rel (%p2128_p9) target bundleno = 61 (0x3d), region = 32 }
  0x17   : > { %s4851_s20 = smov (!%p223_p7, %s2122_s20), 187  ;;  %s4853_s21 = smov (!%p241_p8, %s2125_s21), 5 }
  0x18   : > { %s2123_s25 = sshll.u32 %s4851_s20, 3  ;;  %s2126_s29 = sshll.u32 %s4853_s21, 1 }
  0x19   : > { %s2643_s28 = scalar_lea.vmem %s4563_s0, %s2123_s25  ;;  %s2648_s4 = scalar_lea.vmem %s4564_s1, %s2126_s29 }
  0x1b   : > { %v259_v0 = vlaneseq  ;;  %v2580_v1 = vmov 0.0  }
  0x1c   : > { %258 = vst [vmem:[%s2638_s24] sm:$0x7] %v2580_v1  ;;  %488 = vst [vmem:[#allocation2 + $0x1b0] sm:$0xff] %v2580_v1 }
  0x1d   : > { %490 = vst [vmem:[#allocation2 + $0x18] sm:$0xff] %v2580_v1  ;;  %492 = vst [vmem:[#allocation2 + $0x168] sm:$0xff] %v2580_v1  ;;  %v2685_v2 = vshrl.u32 %v259_v0, 7  ;;  %v2687_v3 = vand.u32 127, %v259_v0 }
  0x1e   : > { %494 = vst [vmem:[#allocation2 + $0x48] sm:$0xff] %v2580_v1  ;;  %496 = vst [vmem:[#allocation2 + $0x110] sm:$0xff] %v2580_v1 }
  0x1f   : > { %498 = vst [vmem:[#allocation2 + $0x98] sm:$0xff] %v2580_v1  ;;  %500 = vst [vmem:[#allocation2 + $0x150] sm:$0xff] %v2580_v1  ;;  %vm295_vm0 = vcmp.eq.s32.totalorder %v2685_v2, %v2687_v3  ;;  %v261_v4 = vadd.s32 8, %v2685_v2  ;;  %v262_v5 = vadd.s32 16, %v2685_v2  ;;  %v263_v6 = vadd.s32 24, %v2685_v2 }
  0x20   : > { %502 = vst [vmem:[#allocation2 + $0x60] sm:$0xff] %v2580_v1  ;;  %504 = vst [vmem:[#allocation2 + $0x188] sm:$0xff] %v2580_v1  ;;  %v2129_v7 = vsel %vm295_vm0, 1.0, %v2580_v1  ;;  %v264_v8 = vadd.s32 32, %v2685_v2  ;;  %v265_v9 = vadd.s32 40, %v2685_v2  ;;  %v266_v10 = vadd.s32 48, %v2685_v2 }
  0x21   : > { %506 = vst [vmem:[#allocation2 + $0x140] sm:$0xff] %v2580_v1  ;;  %508 = vst [vmem:[#allocation2 + $0x1a8] sm:$0xff] %v2580_v1  ;;  %vm297_vm1 = vcmp.eq.s32.totalorder %v261_v4, %v2687_v3  ;;  %vm299_vm2 = vcmp.eq.s32.totalorder %v262_v5, %v2687_v3  ;;  %vm301_vm3 = vcmp.eq.s32.totalorder %v263_v6, %v2687_v3  ;;  %v267_v11 = vadd.s32 56, %v2685_v2 }
  0x22   : > { %510 = vst [vmem:[#allocation2 + $0x28] sm:$0xff] %v2580_v1  ;;  %512 = vst [vmem:[#allocation2 + $0xf8] sm:$0xff] %v2580_v1  ;;  %v2130_v12 = vsel %vm297_vm1, 1.0, %v2580_v1  ;;  %v2131_v13 = vsel %vm299_vm2, 1.0, %v2580_v1  ;;  %v2132_v14 = vsel %vm301_vm3, 1.0, %v2580_v1  ;;  %vm303_vm4 = vcmp.eq.s32.totalorder %v264_v8, %v2687_v3 }
  0x23   : > { %514 = vst [vmem:[#allocation2 + $0x30] sm:$0xff] %v2580_v1  ;;  %516 = vst [vmem:[#allocation2] sm:$0xff] %v2580_v1  ;;  %v2133_v15 = vsel %vm303_vm4, 1.0, %v2580_v1  ;;  %vm305_vm5 = vcmp.eq.s32.totalorder %v265_v9, %v2687_v3  ;;  %vm307_vm6 = vcmp.eq.s32.totalorder %v266_v10, %v2687_v3  ;;  %vm309_vm7 = vcmp.eq.s32.totalorder %v267_v11, %v2687_v3 }
  0x24   : > { %518 = vst [vmem:[#allocation2 + $0x8] sm:$0xff] %v2580_v1  ;;  %519 = vst [vmem:[#allocation2 + $0x148] sm:$0xff] %v2580_v1  ;;  %v2134_v16 = vsel %vm305_vm5, 1.0, %v2580_v1  ;;  %v2135_v17 = vsel %vm307_vm6, 1.0, %v2580_v1  ;;  %v2136_v18 = vsel %vm309_vm7, 1.0, %v2580_v1  ;;  %v268_v19 = vadd.s32 64, %v2685_v2 }
  0x25   : > { %521 = vst [vmem:[#allocation2 + $0x100] sm:$0xff] %v2580_v1  ;;  %523 = vst [vmem:[#allocation2 + $0x40] sm:$0xff] %v2580_v1  ;;  %v269_v20 = vadd.s32 72, %v2685_v2  ;;  %v270_v21 = vadd.s32 80, %v2685_v2  ;;  %v271_v22 = vadd.s32 88, %v2685_v2  ;;  %v272_v23 = vadd.s32 96, %v2685_v2 }
  0x26   : > { %525 = vst [vmem:[#allocation2 + $0x20] sm:$0xff] %v2580_v1  ;;  %527 = vst [vmem:[#allocation2 + $0x1a0] sm:$0xff] %v2580_v1  ;;  %vm311_vm8 = vcmp.eq.s32.totalorder %v268_v19, %v2687_v3  ;;  %v273_v24 = vadd.s32 104, %v2685_v2  ;;  %v274_v25 = vadd.s32 112, %v2685_v2  ;;  %v275_v26 = vadd.s32 120, %v2685_v2 }
  0x27   : > { %529 = vst [vmem:[#allocation2 + $0xe8] sm:$0xff] %v2580_v1  ;;  %531 = vst [vmem:[#allocation2 + $0x70] sm:$0xff] %v2580_v1  ;;  %v2137_v27 = vsel %vm311_vm8, 1.0, %v2580_v1  ;;  %vm313_vm9 = vcmp.eq.s32.totalorder %v269_v20, %v2687_v3  ;;  %vm315_vm10 = vcmp.eq.s32.totalorder %v270_v21, %v2687_v3  ;;  %vm317_vm11 = vcmp.eq.s32.totalorder %v271_v22, %v2687_v3 }
  0x28   : > { %533 = vst [vmem:[#allocation2 + $0x1d8] sm:$0xff] %v2580_v1  ;;  %535 = vst [vmem:[#allocation2 + $0xb8] sm:$0xff] %v2580_v1  ;;  %v2138_v28 = vsel %vm313_vm9, 1.0, %v2580_v1  ;;  %v2139_v29 = vsel %vm315_vm10, 1.0, %v2580_v1  ;;  %v2140_v30 = vsel %vm317_vm11, 1.0, %v2580_v1  ;;  %vm319_vm12 = vcmp.eq.s32.totalorder %v272_v23, %v2687_v3 }
  0x29   : > { %537 = vst [vmem:[#allocation2 + $0xa8] sm:$0xff] %v2580_v1  ;;  %539 = vst [vmem:[#allocation2 + $0x170] sm:$0xff] %v2580_v1  ;;  %v2141_v31 = vsel %vm319_vm12, 1.0, %v2580_v1  ;;  %vm321_vm13 = vcmp.eq.s32.totalorder %v273_v24, %v2687_v3  ;;  %vm323_vm14 = vcmp.eq.s32.totalorder %v274_v25, %v2687_v3  ;;  %vm325_vm15 = vcmp.eq.s32.totalorder %v275_v26, %v2687_v3 }
  0x2a   : > { %541 = vst [vmem:[#allocation2 + $0x68] sm:$0xff] %v2580_v1  ;;  %543 = vst [vmem:[#allocation2 + $0x198] sm:$0xff] %v2580_v1  ;;  %v2142_v32 = vsel %vm321_vm13, 1.0, %v2580_v1  ;;  %v2143_v33 = vsel %vm323_vm14, 1.0, %v2580_v1  ;;  %v2144_v34 = vsel %vm325_vm15, 1.0, %v2580_v1  ;;  %v276_v35 = vadd.s32 128, %v2685_v2 }
  0x2b   : > { %545 = vst [vmem:[#allocation2 + $0xc0] sm:$0xff] %v2580_v1  ;;  %547 = vst [vmem:[#allocation2 + $0x158] sm:$0xff] %v2580_v1  ;;  %v294_v36 = vadd.s32 128, %v2687_v3  ;;  %v277_v37 = vadd.s32 136, %v2685_v2  ;;  %v278_v38 = vadd.s32 144, %v2685_v2  ;;  %v279_v39 = vadd.s32 152, %v2685_v2 }
  0x2c   : > { %549 = vst [vmem:[#allocation2 + $0x58] sm:$0xff] %v2580_v1  ;;  %487 = vst [vmem:[#allocation2 + $0xb0] sm:$0xff] %v2129_v7  ;;  %v280_v40 = vadd.s32 160, %v2685_v2  ;;  %v281_v41 = vadd.s32 168, %v2685_v2  ;;  %v282_v42 = vadd.s32 176, %v2685_v2  ;;  %v283_v43 = vadd.s32 184, %v2685_v2 }
  0x2d   : > { %489 = vst [vmem:[#allocation2 + $0xd8] sm:$0xff] %v2130_v12  ;;  %491 = vst [vmem:[#allocation2 + $0x50] sm:$0xff] %v2131_v13  ;;  %vm328_vm0 = vcmp.eq.s32.totalorder %v276_v35, %v294_v36  ;;  %vm330_vm1 = vcmp.eq.s32.totalorder %v277_v37, %v294_v36  ;;  %vm332_vm2 = vcmp.eq.s32.totalorder %v278_v38, %v294_v36  ;;  %v284_v52 = vadd.s32 192, %v2685_v2 }
  0x2e   : > { %493 = vst [vmem:[#allocation2 + $0x130] sm:$0xff] %v2132_v14  ;;  %495 = vst [vmem:[#allocation2 + $0x180] sm:$0xff] %v2133_v15  ;;  %vm334_vm3 = vcmp.eq.s32.totalorder %v279_v39, %v294_v36  ;;  %v2145_v44 = vsel %vm328_vm0, 1.0, %v2580_v1  ;;  %v2146_v45 = vsel %vm330_vm1, 1.0, %v2580_v1  ;;  %v2147_v46 = vsel %vm332_vm2, 1.0, %v2580_v1 }
  0x2f   : > { %497 = vst [vmem:[#allocation2 + $0x118] sm:$0xff] %v2134_v16  ;;  %499 = vst [vmem:[#allocation2 + $0x120] sm:$0xff] %v2135_v17  ;;  %v2148_v47 = vsel %vm334_vm3, 1.0, %v2580_v1  ;;  %vm336_vm4 = vcmp.eq.s32.totalorder %v280_v40, %v294_v36  ;;  %vm338_vm5 = vcmp.eq.s32.totalorder %v281_v41, %v294_v36  ;;  %vm340_vm6 = vcmp.eq.s32.totalorder %v282_v42, %v294_v36 }
  0x30   : > { %501 = vst [vmem:[#allocation2 + $0x108] sm:$0xff] %v2136_v18  ;;  %503 = vst [vmem:[#allocation2 + $0xe0] sm:$0xff] %v2137_v27  ;;  %vm342_vm7 = vcmp.eq.s32.totalorder %v283_v43, %v294_v36  ;;  %v2149_v48 = vsel %vm336_vm4, 1.0, %v2580_v1  ;;  %v2150_v49 = vsel %vm338_vm5, 1.0, %v2580_v1  ;;  %v2151_v50 = vsel %vm340_vm6, 1.0, %v2580_v1 }
  0x31   : > { %505 = vst [vmem:[#allocation2 + $0x138] sm:$0xff] %v2138_v28  ;;  %507 = vst [vmem:[#allocation2 + $0x80] sm:$0xff] %v2139_v29  ;;  %v2152_v51 = vsel %vm342_vm7, 1.0, %v2580_v1  ;;  %v285_v53 = vadd.s32 200, %v2685_v2  ;;  %v286_v54 = vadd.s32 208, %v2685_v2  ;;  %v287_v55 = vadd.s32 216, %v2685_v2 }
  0x32   : > { %509 = vst [vmem:[#allocation2 + $0x1b8] sm:$0xff] %v2140_v30  ;;  %511 = vst [vmem:[#allocation2 + $0x1e8] sm:$0xff] %v2141_v31  ;;  %v288_v56 = vadd.s32 224, %v2685_v2  ;;  %v289_v57 = vadd.s32 232, %v2685_v2  ;;  %v290_v58 = vadd.s32 240, %v2685_v2  ;;  %v291_v59 = vadd.s32 248, %v2685_v2 }
  0x33   : > { %513 = vst [vmem:[#allocation2 + $0x160] sm:$0xff] %v2142_v32  ;;  %515 = vst [vmem:[#allocation2 + $0x1e0] sm:$0xff] %v2143_v33  ;;  %vm344_vm8 = vcmp.eq.s32.totalorder %v284_v52, %v294_v36  ;;  %vm346_vm9 = vcmp.eq.s32.totalorder %v285_v53, %v294_v36  ;;  %vm348_vm10 = vcmp.eq.s32.totalorder %v286_v54, %v294_v36 }
  0x34   : > { %517 = vst [vmem:[#allocation2 + $0xf0] sm:$0xff] %v2144_v34  ;;  %520 = vst [vmem:[#allocation2 + $0x1d0] sm:$0xff] %v2145_v44  ;;  %vm350_vm11 = vcmp.eq.s32.totalorder %v287_v55, %v294_v36  ;;  %v2153_v60 = vsel %vm344_vm8, 1.0, %v2580_v1  ;;  %v2154_v61 = vsel %vm346_vm9, 1.0, %v2580_v1  ;;  %v2155_v62 = vsel %vm348_vm10, 1.0, %v2580_v1 }
  0x35   : > { %522 = vst [vmem:[#allocation2 + $0xc8] sm:$0xff] %v2146_v45  ;;  %524 = vst [vmem:[#allocation2 + $0x1f8] sm:$0xff] %v2147_v46  ;;  %v2156_v63 = vsel %vm350_vm11, 1.0, %v2580_v1  ;;  %vm352_vm12 = vcmp.eq.s32.totalorder %v288_v56, %v294_v36  ;;  %vm354_vm13 = vcmp.eq.s32.totalorder %v289_v57, %v294_v36  ;;  %vm356_vm14 = vcmp.eq.s32.totalorder %v290_v58, %v294_v36 }
  0x36   : > { %526 = vst [vmem:[#allocation2 + $0x128] sm:$0xff] %v2148_v47  ;;  %528 = vst [vmem:[#allocation2 + $0x1f0] sm:$0xff] %v2149_v48  ;;  %vm358_vm15 = vcmp.eq.s32.totalorder %v291_v59, %v294_v36  ;;  %v2157_v0 = vsel %vm352_vm12, 1.0, %v2580_v1  ;;  %v2158_v2 = vsel %vm354_vm13, 1.0, %v2580_v1  ;;  %v2159_v3 = vsel %vm356_vm14, 1.0, %v2580_v1 }
  0x37   : > { %530 = vst [vmem:[#allocation2 + $0x78] sm:$0xff] %v2150_v49  ;;  %532 = vst [vmem:[#allocation2 + $0x90] sm:$0xff] %v2151_v50  ;;  %v2160_v4 = vsel %vm358_vm15, 1.0, %v2580_v1 }
  0x38   : > { %534 = vst [vmem:[#allocation2 + $0xd0] sm:$0xff] %v2152_v51  ;;  %536 = vst [vmem:[#allocation2 + $0x88] sm:$0xff] %v2153_v60 }
  0x39   : > { %538 = vst [vmem:[#allocation2 + $0x1c8] sm:$0xff] %v2154_v61  ;;  %540 = vst [vmem:[#allocation2 + $0x178] sm:$0xff] %v2155_v62 }
  0x3a   : > { %542 = vst [vmem:[#allocation2 + $0x190] sm:$0xff] %v2156_v63  ;;  %544 = vst [vmem:[#allocation2 + $0x38] sm:$0xff] %v2157_v0 }
  0x3b   : > { %546 = vst [vmem:[#allocation2 + $0x1c0] sm:$0xff] %v2158_v2  ;;  %548 = vst [vmem:[#allocation2 + $0x10] sm:$0xff] %v2159_v3 }
  0x3c   : > { %550 = vst [vmem:[#allocation2 + $0xa0] sm:$0xff] %v2160_v4 }
  0x3d PF: > { %s2162_s5 = sshll.u32 %s2631_s17, 9  ;;  %v554_v5 = vlaneseq  ;;  %v2771_v6 = vld [vmem:[#allocation2 + $0xb0] sm:$0xff]  ;;  %v2775_v8 = vld [vmem:[#allocation2 + $0xd8] sm:$0xff]  ;;  %v2781_v11 = vld [vmem:[#allocation2 + $0x168] sm:$0xff]  ;;  %s3004_s6 = smov 0  }
  0x3e   : > { %4583 = vst [vmem:[#allocation3_spill] sm:$0xff] %v2771_v6  ;;  %v2773_v7 = vld [vmem:[#allocation2 + $0x1b0] sm:$0xff]  ;;  %4585 = vst [vmem:[#allocation5_spill] sm:$0xff] %v2775_v8  ;;  %v2777_v9 = vld [vmem:[#allocation2 + $0x18] sm:$0xff] }
  0x3f   : > { %4584 = vst [vmem:[#allocation4_spill] sm:$0xff] %v2773_v7  ;;  %4586 = vst [vmem:[#allocation6_spill] sm:$0xff] %v2777_v9  ;;  %v2779_v10 = vld [vmem:[#allocation2 + $0x50] sm:$0xff]  ;;  %v555_v1 = vand.u32 127, %v554_v5  ;;  %v2783_v12 = vshrl.u32 %v554_v5, 7  ;;  %v2787_v14 = vld [vmem:[#allocation2 + $0x48] sm:$0xff] }
  0x40   : > { %4587 = vst [vmem:[#allocation7_spill] sm:$0xff] %v2779_v10  ;;  %4588 = vst [vmem:[#allocation8_spill] sm:$0xff] %v2781_v11  ;;  %v2785_v13 = vld [vmem:[#allocation2 + $0x130] sm:$0xff]  ;;  %v2789_v15 = vld [vmem:[#allocation2 + $0x180] sm:$0xff] }
  0x41   : > { %4589 = vst [vmem:[#allocation9_spill] sm:$0xff] %v2783_v12  ;;  %4590 = vst [vmem:[#allocation10_spill] sm:$0xff] %v2785_v13  ;;  %v2791_v16 = vld [vmem:[#allocation2 + $0x110] sm:$0xff]  ;;  %v2793_v17 = vld [vmem:[#allocation2 + $0x118] sm:$0xff]  ;;  %v2797_v19 = vcvt.s32.f32 %v555_v1  ;;  %v2800_v20 = vadd.s32 8, %v2783_v12  ;;  %v2803_v21 = vadd.s32 16, %v2783_v12 }
  0x42   : > { %4591 = vst [vmem:[#allocation11_spill] sm:$0xff] %v2787_v14  ;;  %4592 = vst [vmem:[#allocation12_spill] sm:$0xff] %v2789_v15  ;;  %v2795_v18 = vld [vmem:[#allocation2 + $0x98] sm:$0xff]  ;;  %v2806_v22 = vadd.s32 24, %v2783_v12  ;;  %v2808_v23 = vld [vmem:[#allocation2 + $0x120] sm:$0xff]  ;;  %v2815_v26 = vadd.s32 32, %v2783_v12 }
  0x43   : > { %4593 = vst [vmem:[#allocation13_spill] sm:$0xff] %v2791_v16  ;;  %4594 = vst [vmem:[#allocation14_spill] sm:$0xff] %v2793_v17  ;;  %v2810_v24 = vld [vmem:[#allocation2 + $0x150] sm:$0xff]  ;;  %v2812_v25 = vld [vmem:[#allocation2 + $0x108] sm:$0xff]  ;;  %v2818_v27 = vadd.s32 40, %v2783_v12  ;;  %v2821_v28 = vadd.s32 48, %v2783_v12 }
  0x44   : > { %4595 = vst [vmem:[#allocation15_spill] sm:$0xff] %v2795_v18  ;;  %4596 = vst [vmem:[#allocation16_spill] sm:$0xff] %v2797_v19  ;;  %v2824_v29 = vadd.s32 56, %v2783_v12  ;;  %v2826_v30 = vld [vmem:[#allocation2 + $0x60] sm:$0xff]  ;;  %v2831_v32 = vmul.f32 0.06666667, %v2797_v19 }
  0x45   : > { %4597 = vst [vmem:[#allocation17_spill] sm:$0xff] %v2800_v20  ;;  %4598 = vst [vmem:[#allocation18_spill] sm:$0xff] %v2803_v21  ;;  %v2828_v31 = vld [vmem:[#allocation2 + $0xe0] sm:$0xff]  ;;  %v559_v33 = vadd.f32 1.0, %v2797_v19  ;;  %v2835_v34 = vadd.s32 64, %v2783_v12  ;;  %v2838_v35 = vadd.s32 72, %v2783_v12 }
  0x46   : > { %4599 = vst [vmem:[#allocation19_spill] sm:$0xff] %v2806_v22  ;;  %4600 = vst [vmem:[#allocation20_spill] sm:$0xff] %v2808_v23  ;;  %v2840_v36 = vld [vmem:[#allocation2 + $0x188] sm:$0xff]  ;;  %v2843_v37 = vadd.s32 80, %v2783_v12  ;;  %v2846_v38 = vadd.s32 88, %v2783_v12  ;;  %v2849_v39 = vadd.s32 96, %v2783_v12 }
  0x47   : > { %4601 = vst [vmem:[#allocation21_spill] sm:$0xff] %v2810_v24  ;;  %4602 = vst [vmem:[#allocation22_spill] sm:$0xff] %v2812_v25  ;;  %v2852_v40 = vadd.s32 104, %v2783_v12  ;;  %v2854_v41 = vld [vmem:[#allocation2 + $0x138] sm:$0xff]  ;;  %v2856_v42 = vld [vmem:[#allocation2 + $0x140] sm:$0xff]  ;;  %v2861_v44 = vadd.s32 112, %v2783_v12 }
  0x48   : > { %4603 = vst [vmem:[#allocation23_spill] sm:$0xff] %v2815_v26  ;;  %4604 = vst [vmem:[#allocation24_spill] sm:$0xff] %v2818_v27  ;;  %v2858_v43 = vmul.f32 0.06666667, %v559_v33  ;;  %v2864_v45 = vadd.s32 120, %v2783_v12  ;;  %v2867_v46 = vadd.s32 128, %v2783_v12 }
  0x49   : > { %4605 = vst [vmem:[#allocation25_spill] sm:$0xff] %v2821_v28  ;;  %4606 = vst [vmem:[#allocation26_spill] sm:$0xff] %v2824_v29  ;;  %v2869_v47 = vld [vmem:[#allocation2 + $0x80] sm:$0xff]  ;;  %v2872_v48 = vadd.s32 136, %v2783_v12  ;;  %v2875_v49 = vadd.s32 144, %v2783_v12  ;;  %v2878_v50 = vadd.s32 152, %v2783_v12 }
  0x4a   : > { %4607 = vst [vmem:[#allocation27_spill] sm:$0xff] %v2826_v30  ;;  %4608 = vst [vmem:[#allocation28_spill] sm:$0xff] %v2828_v31  ;;  %v2881_v51 = vadd.s32 160, %v2783_v12  ;;  %v2883_v52 = vld [vmem:[#allocation2 + $0x1a8] sm:$0xff]  ;;  %v2885_v53 = vld [vmem:[#allocation2 + $0x1b8] sm:$0xff]  ;;  %v2888_v54 = vadd.s32 168, %v2783_v12 }
  0x4b   : > { %4609 = vst [vmem:[#allocation29_spill] sm:$0xff] %v2831_v32  ;;  %4610 = vst [vmem:[#allocation30_spill] sm:$0xff] %v2835_v34  ;;  %v2891_v55 = vadd.s32 176, %v2783_v12  ;;  %v2894_v56 = vadd.s32 184, %v2783_v12  ;;  %v2897_v57 = vadd.s32 192, %v2783_v12  ;;  %v2899_v58 = vld [vmem:[#allocation2 + $0x28] sm:$0xff] }
  0x4c   : > { %4611 = vst [vmem:[#allocation31_spill] sm:$0xff] %v2838_v35  ;;  %4612 = vst [vmem:[#allocation32_spill] sm:$0xff] %v2840_v36  ;;  %v2901_v59 = vld [vmem:[#allocation2 + $0x1e8] sm:$0xff]  ;;  %v2904_v60 = vadd.s32 200, %v2783_v12  ;;  %v2907_v61 = vadd.s32 208, %v2783_v12  ;;  %v2910_v62 = vadd.s32 216, %v2783_v12 }
  0x4d   : > { %4613 = vst [vmem:[#allocation33_spill] sm:$0xff] %v2843_v37  ;;  %4614 = vst [vmem:[#allocation34_spill] sm:$0xff] %v2846_v38  ;;  %v2913_v63 = vadd.s32 224, %v2783_v12  ;;  %v2915_v0 = vld [vmem:[#allocation2 + $0xf8] sm:$0xff]  ;;  %v2917_v2 = vld [vmem:[#allocation2 + $0x160] sm:$0xff]  ;;  %v2920_v3 = vadd.s32 232, %v2783_v12 }
  0x4e   : > { %4615 = vst [vmem:[#allocation35_spill] sm:$0xff] %v2849_v39  ;;  %4616 = vst [vmem:[#allocation36_spill] sm:$0xff] %v2852_v40  ;;  %v2923_v4 = vadd.s32 240, %v2783_v12  ;;  %v2926_v5 = vadd.s32 248, %v2783_v12  ;;  %v2928_v1 = vld [vmem:[#allocation2 + $0x30] sm:$0xff]  ;;  %v2930_v33 = vld [vmem:[#allocation2 + $0x1e0] sm:$0xff] }
  0x4f   : > { %4617 = vst [vmem:[#allocation37_spill] sm:$0xff] %v2854_v41  ;;  %4618 = vst [vmem:[#allocation38_spill] sm:$0xff] %v2856_v42  ;;  %v2936_v32 = vld [vmem:[#allocation2 + $0x8] sm:$0xff]  ;;  %v2940_v34 = vld [vmem:[#allocation2 + $0x1d0] sm:$0xff] }
  0x50   : > { %4619 = vst [vmem:[#allocation39_spill] sm:$0xff] %v2858_v43  ;;  %4620 = vst [vmem:[#allocation40_spill] sm:$0xff] %v2861_v44  ;;  %v2932_v44 = vld [vmem:[#allocation2] sm:$0xff]  ;;  %v2934_v43 = vld [vmem:[#allocation2 + $0xf0] sm:$0xff] }
  0x51   : > { %4621 = vst [vmem:[#allocation41_spill] sm:$0xff] %v2864_v45  ;;  %4622 = vst [vmem:[#allocation42_spill] sm:$0xff] %v2867_v46  ;;  %v2938_v39 = vld [vmem:[#allocation2 + $0x148] sm:$0xff]  ;;  %v2942_v40 = vld [vmem:[#allocation2 + $0x100] sm:$0xff] }
  0x52   : > { %4623 = vst [vmem:[#allocation43_spill] sm:$0xff] %v2869_v47  ;;  %4624 = vst [vmem:[#allocation44_spill] sm:$0xff] %v2872_v48  ;;  %v2948_v45 = vld [vmem:[#allocation2 + $0x1f8] sm:$0xff]  ;;  %v2952_v37 = vld [vmem:[#allocation2 + $0x128] sm:$0xff] }
  0x53   : > { %4625 = vst [vmem:[#allocation45_spill] sm:$0xff] %v2875_v49  ;;  %4626 = vst [vmem:[#allocation46_spill] sm:$0xff] %v2878_v50  ;;  %v2954_v38 = vld [vmem:[#allocation2 + $0x1a0] sm:$0xff]  ;;  %v2960_v35 = vld [vmem:[#allocation2 + $0x78] sm:$0xff] }
  0x54   : > { %4627 = vst [vmem:[#allocation47_spill] sm:$0xff] %v2881_v51  ;;  %4628 = vst [vmem:[#allocation48_spill] sm:$0xff] %v2883_v52  ;;  %v2968_v28 = vld [vmem:[#allocation2 + $0xd0] sm:$0xff]  ;;  %v2972_v26 = vld [vmem:[#allocation2 + $0x88] sm:$0xff] }
  0x55   : > { %4629 = vst [vmem:[#allocation49_spill] sm:$0xff] %v2885_v53  ;;  %4630 = vst [vmem:[#allocation50_spill] sm:$0xff] %v2888_v54  ;;  %v2974_v29 = vld [vmem:[#allocation2 + $0xa8] sm:$0xff]  ;;  %v2978_v27 = vld [vmem:[#allocation2 + $0x170] sm:$0xff] }
  0x56   : > { %4631 = vst [vmem:[#allocation51_spill] sm:$0xff] %v2891_v55  ;;  %4632 = vst [vmem:[#allocation52_spill] sm:$0xff] %v2894_v56  ;;  %v2970_v55 = vld [vmem:[#allocation2 + $0xb8] sm:$0xff]  ;;  %v2976_v56 = vld [vmem:[#allocation2 + $0x1c8] sm:$0xff] }
  0x57   : > { %4633 = vst [vmem:[#allocation53_spill] sm:$0xff] %v2897_v57  ;;  %4634 = vst [vmem:[#allocation54_spill] sm:$0xff] %v2899_v58  ;;  %v2946_v57 = vld [vmem:[#allocation2 + $0x40] sm:$0xff]  ;;  %v2980_v54 = vld [vmem:[#allocation2 + $0x178] sm:$0xff] }
  0x58   : > { %4635 = vst [vmem:[#allocation55_spill] sm:$0xff] %v2901_v59  ;;  %4636 = vst [vmem:[#allocation56_spill] sm:$0xff] %v2904_v60  ;;  %v2966_v60 = vld [vmem:[#allocation2 + $0x1d8] sm:$0xff]  ;;  %v2982_v51 = vld [vmem:[#allocation2 + $0x68] sm:$0xff] }
  0x59   : > { %4637 = vst [vmem:[#allocation57_spill] sm:$0xff] %v2907_v61  ;;  %4638 = vst [vmem:[#allocation58_spill] sm:$0xff] %v2910_v62  ;;  %v2962_v61 = vld [vmem:[#allocation2 + $0x70] sm:$0xff]  ;;  %v2986_v49 = vld [vmem:[#allocation2 + $0x198] sm:$0xff] }
  0x5a   : > { %4639 = vst [vmem:[#allocation59_spill] sm:$0xff] %v2913_v63  ;;  %4640 = vst [vmem:[#allocation60_spill] sm:$0xff] %v2915_v0  ;;  %v2956_v63 = vld [vmem:[#allocation2 + $0x1f0] sm:$0xff]  ;;  %v2988_v22 = vld [vmem:[#allocation2 + $0x38] sm:$0xff] }
  0x5b   : > { %4641 = vst [vmem:[#allocation61_spill] sm:$0xff] %v2917_v2  ;;  %4642 = vst [vmem:[#allocation62_spill] sm:$0xff] %v2920_v3  ;;  %v2958_v3 = vld [vmem:[#allocation2 + $0xe8] sm:$0xff]  ;;  %v2964_v62 = vld [vmem:[#allocation2 + $0x90] sm:$0xff] }
  0x5c   : > { %4643 = vst [vmem:[#allocation63_spill] sm:$0xff] %v2923_v4  ;;  %4644 = vst [vmem:[#allocation64_spill] sm:$0xff] %v2926_v5  ;;  %v2944_v4 = vld [vmem:[#allocation2 + $0xc8] sm:$0xff]  ;;  %v2950_v5 = vld [vmem:[#allocation2 + $0x20] sm:$0xff] }
  0x5d   : > { %4645 = vst [vmem:[#allocation65_spill] sm:$0xff] %v2928_v1  ;;  %4646 = vst [vmem:[#allocation66_spill] sm:$0xff] %v2930_v33  ;;  %v2984_v21 = vld [vmem:[#allocation2 + $0x190] sm:$0xff]  ;;  %v2990_v50 = vld [vmem:[#allocation2 + $0xc0] sm:$0xff] }
  0x5e   : > { %4647 = vst [vmem:[#allocation67_spill] sm:$0xff] %v2932_v44  ;;  %4648 = vst [vmem:[#allocation68_spill] sm:$0xff] %v2934_v43  ;;  %v2992_v20 = vld [vmem:[#allocation2 + $0x1c0] sm:$0xff]  ;;  %v2994_v46 = vld [vmem:[#allocation2 + $0x158] sm:$0xff]  ;;  %v3002_v44 = vmov 0.0  }
  0x5f   : > { %4649 = vst [vmem:[#allocation69_spill] sm:$0xff] %v2936_v32  ;;  %4650 = vst [vmem:[#allocation70_spill] sm:$0xff] %v2938_v39  ;;  %v2996_v48 = vld [vmem:[#allocation2 + $0x10] sm:$0xff]  ;;  %v2998_v32 = vld [vmem:[#allocation2 + $0x58] sm:$0xff] }
  0x60   : > { %4651 = vst [vmem:[#allocation71_spill] sm:$0xff] %v2940_v34  ;;  %4652 = vst [vmem:[#allocation72_spill] sm:$0xff] %v2942_v40  ;;  %v3000_v43 = vld [vmem:[#allocation2 + $0xa0] sm:$0xff] }
  0x61   : > { %4653 = vst [vmem:[#allocation73_spill] sm:$0xff] %v2944_v4  ;;  %4654 = vst [vmem:[#allocation74_spill] sm:$0xff] %v2946_v57 }
  0x62   : > { %4655 = vst [vmem:[#allocation75_spill] sm:$0xff] %v2948_v45  ;;  %4656 = vst [vmem:[#allocation76_spill] sm:$0xff] %v2950_v5 }
  0x63   : > { %4657 = vst [vmem:[#allocation77_spill] sm:$0xff] %v2952_v37  ;;  %4658 = vst [vmem:[#allocation78_spill] sm:$0xff] %v2954_v38 }
  0x64   : > { %4659 = vst [vmem:[#allocation79_spill] sm:$0xff] %v2956_v63  ;;  %4660 = vst [vmem:[#allocation80_spill] sm:$0xff] %v2958_v3 }
  0x65   : > { %4661 = vst [vmem:[#allocation81_spill] sm:$0xff] %v2960_v35  ;;  %4662 = vst [vmem:[#allocation82_spill] sm:$0xff] %v2962_v61 }
  0x66   : > { %4663 = vst [vmem:[#allocation83_spill] sm:$0xff] %v2964_v62  ;;  %4664 = vst [vmem:[#allocation84_spill] sm:$0xff] %v2966_v60 }
  0x67   : > { %4665 = vst [vmem:[#allocation85_spill] sm:$0xff] %v2968_v28  ;;  %4666 = vst [vmem:[#allocation86_spill] sm:$0xff] %v2970_v55 }
  0x68   : > { %4667 = vst [vmem:[#allocation87_spill] sm:$0xff] %v2972_v26  ;;  %4668 = vst [vmem:[#allocation88_spill] sm:$0xff] %v2974_v29 }
  0x69   : > { %4669 = vst [vmem:[#allocation89_spill] sm:$0xff] %v2976_v56  ;;  %4670 = vst [vmem:[#allocation90_spill] sm:$0xff] %v2978_v27 }
  0x6a   : > { %4671 = vst [vmem:[#allocation91_spill] sm:$0xff] %v2980_v54  ;;  %4672 = vst [vmem:[#allocation92_spill] sm:$0xff] %v2982_v51 }
  0x6b   : > { %4673 = vst [vmem:[#allocation93_spill] sm:$0xff] %v2984_v21  ;;  %4674 = vst [vmem:[#allocation94_spill] sm:$0xff] %v2986_v49 }
  0x6c   : > { %4675 = vst [vmem:[#allocation95_spill] sm:$0xff] %v2988_v22  ;;  %4676 = vst [vmem:[#allocation96_spill] sm:$0xff] %v2990_v50 }
  0x6d   : > { %4677 = vst [vmem:[#allocation97_spill] sm:$0xff] %v2992_v20  ;;  %4678 = vst [vmem:[#allocation98_spill] sm:$0xff] %v2994_v46 }
  0x6e   : > { %4679 = vst [vmem:[#allocation99_spill] sm:$0xff] %v2996_v48  ;;  %4680 = vst [vmem:[#allocation100_spill] sm:$0xff] %v2998_v32 }
  0x6f   : > { %4681 = vst [vmem:[#allocation101_spill] sm:$0xff] %v3000_v43 }
  0x70 LB: >> { %v4682_v19 = vld [vmem:[#allocation16_spill] sm:$0xff]  ;;  %v4683_v12 = vld [vmem:[#allocation9_spill] sm:$0xff]  ;;  %4684 = vst [vmem:[#allocation102_spill] sm:$0xff] %v2574_v44  ;;  %s2163_s7 = sshll.u32 %s2578_s6, 8  ;;  %vm699_vm0 = vcmask 130048   ;;  %s2164_s9 = sshll.u32 %s2578_s6, 1  ;;  %s2578_s6 = sphi %s3004_s6, %s663_s6   ;;  %v2574_v44 = vphi %v3002_v44, %v4837_v44  }
  0x71   : >> { %s3016_s8 = scalar_lea.vmem %s2643_s28, %s2163_s7  ;;  %s1213_s10 = scalar_lea.vmem %s2648_s4, %s2164_s9  ;;  %v1218_v28 = vsub.s32 0, %v4683_v12  ;;  %v1222_v60 = vsub.s32 1, %v4683_v12  ;;  %v4685_v39 = vld [vmem:[#allocation70_spill] sm:$0xff]  ;;  %v4686_v34 = vld [vmem:[#allocation71_spill] sm:$0xff]  ;;  %v4688_v7 = vld [vmem:[#allocation4_spill] sm:$0xff] }
  0x72   : >> { %v3019_v43 = vld [vmem:[%s3016_s8 + $0x80] sm:$0xff]  ;;  %v3027_v33 = vld [vmem:[%s3016_s8 + $0x88] sm:$0xff]  ;;  %v3039_v20 = vld [vmem:[%s3016_s8 + $0x90] sm:$0xff]  ;;  %s1482_s16 = sadd.s32 %s2163_s7, %s2162_s5  ;;  %s663_s6 = sadd.s32 1, %s2578_s6  }
  0x73   : >> { %v3022_v32 = vld [vmem:[%s3016_s8] sm:$0xff]  ;;  %v748_v44 = vsel %vm699_vm0, %v3019_v43, -inf  ;;  %v3030_v48 = vld [vmem:[%s3016_s8 + $0x8] sm:$0xff]  ;;  %v751_v1 = vsel %vm699_vm0, %v3027_v33, -inf  ;;  %v3042_v50 = vld [vmem:[%s3016_s8 + $0x98] sm:$0xff]  ;;  %p660_p10 = scmp.ge.s32.totalorder %s663_s6, 2  }
  0x74   : >> { %749 = vmax.xlane.f32.xlu0 %v748_v44  ;;  %v700_v46 = vsel %vm699_vm0, %v3022_v32, -inf  ;;  %v703_v2 = vsel %vm699_vm0, %v3030_v48, -inf  ;;  %v754_v44 = vsel %vm699_vm0, %v3039_v20, -inf  ;;  %v3047_v0 = vld [vmem:[%s3016_s8 + $0x10] sm:$0xff]  ;;  %v3052_v59 = vld [vmem:[%s3016_s8 + $0x18] sm:$0xff]  ;;  %v3062_v49 = vld [vmem:[%s3016_s8 + $0xa8] sm:$0xff] }
  0x75   : >> { %701 = vmax.xlane.f32.xlu1 %v700_v46  ;;  %v757_v46 = vsel %vm699_vm0, %v3042_v50, -inf  ;;  %v706_v22 = vsel %vm699_vm0, %v3047_v0, -inf  ;;  %v763_v58 = vsel %vm699_vm0, %v3062_v49, -inf  ;;  %v3069_v53 = vld [vmem:[%s3016_s8 + $0x20] sm:$0xff]  ;;  %v3079_v21 = vld [vmem:[%s3016_s8 + $0xb0] sm:$0xff]  ;;  %v3082_v51 = vld [vmem:[%s3016_s8 + $0xb8] sm:$0xff] }
  0x76   : >> { %v3089_v52 = vld [vmem:[%s3016_s8 + $0x30] sm:$0xff]  ;;  %v3092_v47 = vld [vmem:[%s3016_s8 + $0x38] sm:$0xff]  ;;  %v3099_v54 = vld [vmem:[%s3016_s8 + $0xc0] sm:$0xff] }
  0x77   : >> { %v3102_v27 = vld [vmem:[%s3016_s8 + $0xc8] sm:$0xff]  ;;  %v3109_v42 = vld [vmem:[%s3016_s8 + $0x40] sm:$0xff]  ;;  %v3119_v56 = vld [vmem:[%s3016_s8 + $0xd0] sm:$0xff] }
  0x78   : >> { %752 = vmax.xlane.f32.xlu0 %v751_v1  ;;  %v3059_v1 = vld [vmem:[%s3016_s8 + $0xa0] sm:$0xff]  ;;  %v3112_v41 = vld [vmem:[%s3016_s8 + $0x48] sm:$0xff]  ;;  %v3122_v29 = vld [vmem:[%s3016_s8 + $0xd8] sm:$0xff] }
  0x79   : >> { %704 = vmax.xlane.f32.xlu1 %v703_v2  ;;  %v709_v2 = vsel %vm699_vm0, %v3052_v59, -inf  ;;  %v3129_v36 = vld [vmem:[%s3016_s8 + $0x50] sm:$0xff]  ;;  %v3132_v31 = vld [vmem:[%s3016_s8 + $0x58] sm:$0xff]  ;;  %v3142_v55 = vld [vmem:[%s3016_s8 + $0xe8] sm:$0xff] }
  0x7a   : >> { %v730_v26 = vsel %vm699_vm0, %v3129_v36, -inf  ;;  %v3154_v25 = vld [vmem:[%s3016_s8 + $0x68] sm:$0xff]  ;;  %v3163_v23 = vld [vmem:[%s3016_s8 + $0xf0] sm:$0xff]  ;;  %v3166_v62 = vld [vmem:[%s3016_s8 + $0xf8] sm:$0xff] }
  0x7b   : >> { %v739_v24 = vsel %vm699_vm0, %v3154_v25, -inf  ;;  %v793_v12 = vsel %vm699_vm0, %v3166_v62, -inf  ;;  %v3177_v18 = vld [vmem:[%s3016_s8 + $0x70] sm:$0xff]  ;;  %v3180_v17 = vld [vmem:[%s3016_s8 + $0x78] sm:$0xff]  ;;  %v4687_v6 = vld [vmem:[#allocation3_spill] sm:$0xff] }
  0x7c   : >> { %755 = vmax.xlane.f32.xlu0 %v754_v44  ;;  %v760_v44 = vsel %vm699_vm0, %v3059_v1, -inf  ;;  %v4689_v40 = vld [vmem:[#allocation72_spill] sm:$0xff]  ;;  %v4690_v4 = vld [vmem:[#allocation73_spill] sm:$0xff]  ;;  %v4692_v9 = vld [vmem:[#allocation6_spill] sm:$0xff] }
  0x7d   : >> { %758 = vmax.xlane.f32.xlu1 %v757_v46  ;;  %v3072_v46 = vld [vmem:[%s3016_s8 + $0x28] sm:$0xff]  ;;  %v4691_v8 = vld [vmem:[#allocation5_spill] sm:$0xff]  ;;  %v4693_v57 = vld [vmem:[#allocation74_spill] sm:$0xff] }
  0x7e   : >> { %v4694_v45 = vld [vmem:[#allocation75_spill] sm:$0xff]  ;;  %v4696_v11 = vld [vmem:[#allocation8_spill] sm:$0xff]  ;;  %v4698_v37 = vld [vmem:[#allocation77_spill] sm:$0xff] }
  0x7f   : >> { %v4695_v10 = vld [vmem:[#allocation7_spill] sm:$0xff]  ;;  %v4697_v5 = vld [vmem:[#allocation76_spill] sm:$0xff]  ;;  %v4699_v13 = vld [vmem:[#allocation10_spill] sm:$0xff] }
  0x80   : >> { %707 = vmax.xlane.f32.xlu0 %v706_v22  ;;  %v712_v22 = vsel %vm699_vm0, %v3069_v53, -inf  ;;  %v4700_v14 = vld [vmem:[#allocation11_spill] sm:$0xff]  ;;  %v4701_v38 = vld [vmem:[#allocation78_spill] sm:$0xff]  ;;  %v4703_v15 = vld [vmem:[#allocation12_spill] sm:$0xff] }
  0x81   : >> { %710 = vmax.xlane.f32.xlu1 %v709_v2  ;;  %v715_v2 = vsel %vm699_vm0, %v3072_v46, -inf  ;;  %v4702_v63 = vld [vmem:[#allocation79_spill] sm:$0xff]  ;;  %v4704_v16 = vld [vmem:[#allocation13_spill] sm:$0xff] }
  0x84   : >> { %761 = vmax.xlane.f32.xlu0 %v760_v44  ;;  %v766_v44 = vsel %vm699_vm0, %v3079_v21, -inf }
  0x85   : >> { %764 = vmax.xlane.f32.xlu1 %v763_v58  ;;  %v769_v58 = vsel %vm699_vm0, %v3082_v51, -inf }
  0x88   : >> { %713 = vmax.xlane.f32.xlu0 %v712_v22  ;;  %v718_v22 = vsel %vm699_vm0, %v3089_v52, -inf }
  0x89   : >> { %716 = vmax.xlane.f32.xlu1 %v715_v2  ;;  %v721_v2 = vsel %vm699_vm0, %v3092_v47, -inf }
  0x8c   : >> { %767 = vmax.xlane.f32.xlu0 %v766_v44  ;;  %v772_v44 = vsel %vm699_vm0, %v3099_v54, -inf }
  0x8d   : >> { %770 = vmax.xlane.f32.xlu1 %v769_v58  ;;  %v775_v58 = vsel %vm699_vm0, %v3102_v27, -inf }
  0x90   : >> { %719 = vmax.xlane.f32.xlu0 %v718_v22  ;;  %v724_v22 = vsel %vm699_vm0, %v3109_v42, -inf }
  0x91   : >> { %722 = vmax.xlane.f32.xlu1 %v721_v2  ;;  %v727_v2 = vsel %vm699_vm0, %v3112_v41, -inf }
  0x94   : >> { %773 = vmax.xlane.f32.xlu0 %v772_v44  ;;  %v778_v44 = vsel %vm699_vm0, %v3119_v56, -inf }
  0x95   : >> { %776 = vmax.xlane.f32.xlu1 %v775_v58  ;;  %v781_v58 = vsel %vm699_vm0, %v3122_v29, -inf }
  0x98   : >> { %725 = vmax.xlane.f32.xlu0 %v724_v22  ;;  %v733_v22 = vsel %vm699_vm0, %v3132_v31, -inf }
  0x99   : >> { %728 = vmax.xlane.f32.xlu1 %v727_v2  ;;  %v3139_v2 = vld [vmem:[%s3016_s8 + $0xe0] sm:$0xff] }
  0x9a   : >> { %v784_v30 = vsel %vm699_vm0, %v3139_v2, -inf }
  0x9c   : >> { %779 = vmax.xlane.f32.xlu0 %v778_v44  ;;  %v787_v44 = vsel %vm699_vm0, %v3142_v55, -inf }
  0x9d   : >> { %782 = vmax.xlane.f32.xlu1 %v781_v58  ;;  %v3150_v58 = vld [vmem:[%s3016_s8 + $0x60] sm:$0xff] }
  0xa0   : >> { %731 = vmax.xlane.f32.xlu0 %v730_v26  ;;  %v736_v26 = vsel %vm699_vm0, %v3150_v58, -inf }
  0xa1   : >> { %734 = vmax.xlane.f32.xlu1 %v733_v22  ;;  %v1214_v22 = vld [vmem:[%s1213_s10] sm:$0x3] }
  0xa2   : >> { %v3168_v61 = vrot.slane %v1214_v22, %v1218_v28 }
  0xa4   : >> { %785 = vmax.xlane.f32.xlu0 %v784_v30  ;;  %v3170_v30 = vrot.slane %v1214_v22, %v1222_v60  ;;  %v1258_v28 = vmul.f32 %v3168_v61, %v4685_v39  ;;  %v745_v60 = vsel %vm699_vm0, %v3180_v17, -inf  ;;  %v1226_v35 = vmul.f32 %v3168_v61, %v4687_v6 }
  0xa5   : >> { %788 = vmax.xlane.f32.xlu1 %v787_v44  ;;  %v790_v44 = vsel %vm699_vm0, %v3163_v23, -inf  ;;  %v1260_v39 = vmul.f32 %v3168_v61, %v4689_v40 }
  0xa8   : >> { %737 = vmax.xlane.f32.xlu0 %v736_v26  ;;  %v742_v26 = vsel %vm699_vm0, %v3177_v18, -inf }
  0xa9   : >> { %740 = vmax.xlane.f32.xlu1 %v739_v24  ;;  %v1259_v24 = vmul.f32 %v3170_v30, %v4686_v34  ;;  %v1261_v34 = vmul.f32 %v3170_v30, %v4690_v4 }
  0xab   : >> { %v1338_v22 = vadd.f32 %v1259_v24, %v1258_v28  ;;  %v1341_v3 = vadd.f32 %v1261_v34, %v1260_v39  ;;  %v1229_v28 = vmul.f32 %v3170_v30, %v4692_v9  ;;  %v1231_v34 = vmul.f32 %v3170_v30, %v4696_v11 }
  0xac   : >> { %791 = vmax.xlane.f32.xlu0 %v790_v44 }
  0xad   : >> { %794 = vmax.xlane.f32.xlu1 %v793_v12  ;;  %v1227_v12 = vmul.f32 %v3170_v30, %v4688_v7 }
  0xaf   : >> { %v1290_v44 = vadd.f32 %v1227_v12, %v1226_v35  ;;  %v1263_v35 = vmul.f32 %v3170_v30, %v4694_v45  ;;  %v1230_v12 = vmul.f32 %v3168_v61, %v4695_v10 }
  0xb0   : >> { %743 = vmax.xlane.f32.xlu0 %v742_v26  ;;  %v1228_v26 = vmul.f32 %v3168_v61, %v4691_v8 }
  0xb1   : >> { %746 = vmax.xlane.f32.xlu1 %v745_v60  ;;  %v1262_v60 = vmul.f32 %v3168_v61, %v4693_v57  ;;  %v1296_v39 = vadd.f32 %v1231_v34, %v1230_v12 }
  0xb2   : >> { %v1293_v24 = vadd.f32 %v1229_v28, %v1228_v26  ;;  %v1232_v28 = vmul.f32 %v3168_v61, %v4699_v13 }
  0xb5   : >> { %1339 = vadd.xlane.f32.xlu1 %v1338_v22  ;;  %v1344_v22 = vadd.f32 %v1263_v35, %v1262_v60  ;;  %v1266_v35 = vmul.f32 %v3168_v61, %v4701_v38 }
  0xb9   : >> { %1291 = vadd.xlane.f32.xlu1 %v1290_v44  ;;  %v1265_v44 = vmul.f32 %v3170_v30, %v4698_v37 }
  0xbd   : >> { %1342 = vadd.xlane.f32.xlu1 %v1341_v3  ;;  %v1264_v3 = vmul.f32 %v3168_v61, %v4697_v5 }
  0xbf   : >> { %v1347_v26 = vadd.f32 %v1265_v44, %v1264_v3 }
  0xc1   : >> { %1294 = vadd.xlane.f32.xlu1 %v1293_v24  ;;  %v1233_v24 = vmul.f32 %v3170_v30, %v4700_v14 }
  0xc3   : >> { %v1299_v60 = vadd.f32 %v1233_v24, %v1232_v28 }
  0xc5   : >> { %1345 = vadd.xlane.f32.xlu1 %v1344_v22  ;;  %v1267_v22 = vmul.f32 %v3170_v30, %v4702_v63 }
  0xc7   : >> { %v1350_v12 = vadd.f32 %v1267_v22, %v1266_v35 }
  0xc9   : >> { %1297 = vadd.xlane.f32.xlu1 %v1296_v39 }
  0xcd   : >> { %1348 = vadd.xlane.f32.xlu1 %v1347_v26 }
  0xd1   : >> { %1300 = vadd.xlane.f32.xlu1 %v1299_v60 }
  0xd5   : >> { %1351 = vadd.xlane.f32.xlu1 %v1350_v12 }
  0xfd   : >> { %v750_v34 = vpop.xlane.xlu0 %749 }
  0xfe   : >> { %vm1068_vm1 = vcmp.eq.f32.partialorder %v3019_v43, %v750_v34  ;;  %v702_v39 = vpop.xlane.xlu1 %701 }
  0xff   : >> { %v1100_v3 = vsel %vm1068_vm1, %v4682_v19, 16.0  ;;  %vm1052_vm2 = vcmp.eq.f32.partialorder %v3022_v32, %v702_v39 }
 0x100   : >> { %v1164_v44 = vsel %vm699_vm0, %v1100_v3, inf  ;;  %v1084_v26 = vsel %vm1052_vm2, %v4682_v19, 16.0 }
 0x101   : >> { %1165 = vmin.xlane.f32.xlu0 %v1164_v44  ;;  %v753_v28 = vpop.xlane.xlu0 %752  ;;  %v1116_v60 = vsel %vm699_vm0, %v1084_v26, inf }
 0x102   : >> { %v813_v24 = vsub.f32 %v3027_v33, %v753_v28  ;;  %vm1069_vm3 = vcmp.eq.f32.partialorder %v3027_v33, %v753_v28  ;;  %v705_v35 = vpop.xlane.xlu1 %704 }
 0x103   : >> { %v1101_v22 = vsel %vm1069_vm3, %v4682_v19, 16.0  ;;  %v797_v12 = vsub.f32 %v3030_v48, %v705_v35  ;;  %vm1053_vm4 = vcmp.eq.f32.partialorder %v3030_v48, %v705_v35  ;;  %v812_v35 = vsub.f32 %v3019_v43, %v750_v34 }
 0x104   : >> { %v862_v4 = vmul.f32 1.442695, %v813_v24  ;;  %v1167_v44 = vsel %vm699_vm0, %v1101_v22, inf  ;;  %v1085_v26 = vsel %vm1053_vm4, %v4682_v19, 16.0 }
 0x105   : >> { %1117 = vmin.xlane.f32.xlu0 %v1116_v60  ;;  %v830_v3 = vmul.f32 1.442695, %v797_v12  ;;  %v756_v5 = vpop.xlane.xlu0 %755  ;;  %v1119_v24 = vsel %vm699_vm0, %v1085_v26, inf  ;;  %v796_v26 = vsub.f32 %v3022_v32, %v702_v39  ;;  %v860_v8 = vmul.f32 1.442695, %v812_v35 }
 0x106   : >> { %2394 = vpow2.f32 %v862_v4  ;;  %v759_v6 = vpop.xlane.xlu1 %758  ;;  %vm1070_vm5 = vcmp.eq.f32.partialorder %v3039_v20, %v756_v5 }
 0x107   : >> { %2396 = vpow2.f32 %v830_v3  ;;  %v815_v33 = vsub.f32 %v3042_v50, %v759_v6  ;;  %v1102_v60 = vsel %vm1070_vm5, %v4682_v19, 16.0  ;;  %vm1071_vm7 = vcmp.eq.f32.partialorder %v3042_v50, %v759_v6 }
 0x108   : >> { %v1170_v3 = vsel %vm699_vm0, %v1102_v60, inf  ;;  %v828_v9 = vmul.f32 1.442695, %v796_v26  ;;  %v1103_v32 = vsel %vm1071_vm7, %v4682_v19, 16.0  ;;  %v814_v6 = vsub.f32 %v3039_v20, %v756_v5 }
 0x109   : >> { %1168 = vmin.xlane.f32.xlu0 %v1167_v44  ;;  %v708_v28 = vpop.xlane.xlu0 %707  ;;  %v866_v7 = vmul.f32 1.442695, %v815_v33  ;;  %v1173_v26 = vsel %vm699_vm0, %v1103_v32, inf }
 0x10a   : >> { %v711_v48 = vpop.xlane.xlu1 %710  ;;  %vm1054_vm6 = vcmp.eq.f32.partialorder %v3047_v0, %v708_v28  ;;  %v798_v5 = vsub.f32 %v3047_v0, %v708_v28 }
 0x10b   : >> { %2398 = vpow2.f32 %v866_v7  ;;  %v799_v4 = vsub.f32 %v3052_v59, %v711_v48  ;;  %v1086_v33 = vsel %vm1054_vm6, %v4682_v19, 16.0  ;;  %vm1055_vm8 = vcmp.eq.f32.partialorder %v3052_v59, %v711_v48 }
 0x10c   : >> { %v864_v59 = vmul.f32 1.442695, %v814_v6  ;;  %v832_v28 = vmul.f32 1.442695, %v798_v5 }
 0x10d   : >> { %1120 = vmin.xlane.f32.xlu0 %v1119_v24  ;;  %v834_v22 = vmul.f32 1.442695, %v799_v4  ;;  %v3242_v12 = vpop.xlane.xlu0 %761  ;;  %v1122_v24 = vsel %vm699_vm0, %v1086_v33, inf }
 0x10e   : >> { %v3245_v44 = vpop.xlane.xlu1 %764  ;;  %vm1072_vm9 = vcmp.eq.f32.partialorder %v3059_v1, %v3242_v12  ;;  %v816_v6 = vsub.f32 %v3059_v1, %v3242_v12 }
 0x10f   : >> { %2400 = vpow2.f32 %v834_v22  ;;  %v817_v7 = vsub.f32 %v3062_v49, %v3245_v44  ;;  %vm1073_vm11 = vcmp.eq.f32.partialorder %v3062_v49, %v3245_v44 }
 0x110   : >> { %v868_v1 = vmul.f32 1.442695, %v816_v6 }
 0x111   : >> { %1171 = vmin.xlane.f32.xlu0 %v1170_v3  ;;  %v870_v43 = vmul.f32 1.442695, %v817_v7  ;;  %v3252_v34 = vpop.xlane.xlu0 %713 }
 0x112   : >> { %v3255_v60 = vpop.xlane.xlu1 %716  ;;  %vm1056_vm10 = vcmp.eq.f32.partialorder %v3069_v53, %v3252_v34 }
 0x113   : >> { %v2395_v4 = vpop.eup %2394  ;;  %2402 = vpow2.f32 %v870_v43  ;;  %v801_v39 = vsub.f32 %v3072_v46, %v3255_v60  ;;  %v1087_v43 = vsel %vm1055_vm8, %v4682_v19, 16.0  ;;  %vm1057_vm12 = vcmp.eq.f32.partialorder %v3072_v46, %v3255_v60 }
 0x114   : >> { %v2397_v22 = vpop.eup %2396  ;;  %2404 = vpow2.f32 %v860_v8  ;;  %v943_v50 = vsel %vm699_vm0, %v2395_v4, 0.0  ;;  %v1125_v4 = vsel %vm699_vm0, %v1087_v43, inf  ;;  %v1089_v49 = vsel %vm1057_vm12, %v4682_v19, 16.0 }
 0x115   : >> { %1123 = vmin.xlane.f32.xlu0 %v1122_v24  ;;  %944 = vadd.xlane.f32.xlu1 %v943_v50  ;;  %v838_v35 = vmul.f32 1.442695, %v801_v39  ;;  %v3263_v3 = vpop.xlane.xlu0 %767  ;;  %v895_v33 = vsel %vm699_vm0, %v2397_v22, 0.0  ;;  %v1104_v22 = vsel %vm1072_vm9, %v4682_v19, 16.0  ;;  %v1131_v46 = vsel %vm699_vm0, %v1089_v49, inf  ;;  %v4723_v49 = vld [vmem:[#allocation37_spill] sm:$0xff] }
 0x116   : >> { %v3267_v7 = vpop.xlane.xlu1 %770  ;;  %v818_v5 = vsub.f32 %v3079_v21, %v3263_v3  ;;  %vm1074_vm13 = vcmp.eq.f32.partialorder %v3079_v21, %v3263_v3 }
 0x117   : >> { %2406 = vpow2.f32 %v838_v35  ;;  %v819_v8 = vsub.f32 %v3082_v51, %v3267_v7  ;;  %v1106_v60 = vsel %vm1074_vm13, %v4682_v19, 16.0  ;;  %vm1075_vm15 = vcmp.eq.f32.partialorder %v3082_v51, %v3267_v7 }
 0x118   : >> { %v2399_v20 = vpop.eup %2398  ;;  %2408 = vpow2.f32 %v828_v9  ;;  %v1182_v21 = vsel %vm699_vm0, %v1106_v60, inf  ;;  %v4726_v60 = vld [vmem:[#allocation91_spill] sm:$0xff] }
 0x119   : >> { %1174 = vmin.xlane.f32.xlu0 %v1173_v26  ;;  %896 = vadd.xlane.f32.xlu1 %v895_v33  ;;  %v874_v48 = vmul.f32 1.442695, %v819_v8  ;;  %v3275_v24 = vpop.xlane.xlu0 %719  ;;  %v949_v32 = vsel %vm699_vm0, %v2399_v20, 0.0  ;;  %v1176_v26 = vsel %vm699_vm0, %v1104_v22, inf  ;;  %v800_v33 = vsub.f32 %v3069_v53, %v3252_v34  ;;  %v4715_v34 = vld [vmem:[#allocation22_spill] sm:$0xff] }
 0x11a   : >> { %v3279_v39 = vpop.xlane.xlu1 %722  ;;  %vm1058_vm14 = vcmp.eq.f32.partialorder %v3089_v52, %v3275_v24 }
 0x11b   : >> { %2410 = vpow2.f32 %v874_v48  ;;  %v803_v9 = vsub.f32 %v3092_v47, %v3279_v39  ;;  %v1090_v3 = vsel %vm1058_vm14, %v4682_v19, 16.0  ;;  %vm1059_vm1 = vcmp.eq.f32.partialorder %v3092_v47, %v3279_v39 }
 0x11c   : >> { %v2401_v0 = vpop.eup %2400  ;;  %2412 = vpow2.f32 %v864_v59  ;;  %v1091_v7 = vsel %vm1059_vm1, %v4682_v19, 16.0 }
 0x11d   : >> { %1126 = vmin.xlane.f32.xlu0 %v1125_v4  ;;  %950 = vadd.xlane.f32.xlu1 %v949_v32  ;;  %v842_v50 = vmul.f32 1.442695, %v803_v9  ;;  %v3286_v35 = vpop.xlane.xlu0 %773  ;;  %v901_v43 = vsel %vm699_vm0, %v2401_v0, 0.0  ;;  %v836_v32 = vmul.f32 1.442695, %v800_v33  ;;  %v1137_v47 = vsel %vm699_vm0, %v1091_v7, inf }
 0x11e   : >> { %v3292_v8 = vpop.xlane.xlu1 %776  ;;  %vm1076_vm2 = vcmp.eq.f32.partialorder %v3099_v54, %v3286_v35  ;;  %v4733_v7 = vld [vmem:[#allocation94_spill] sm:$0xff] }
 0x11f   : >> { %2414 = vpow2.f32 %v842_v50  ;;  %v821_v20 = vsub.f32 %v3102_v27, %v3292_v8  ;;  %v1108_v39 = vsel %vm1076_vm2, %v4682_v19, 16.0  ;;  %vm1077_vm4 = vcmp.eq.f32.partialorder %v3102_v27, %v3292_v8 }
 0x120   : >> { %v2403_v59 = vpop.eup %2402  ;;  %2416 = vpow2.f32 %v832_v28 }
 0x121   : >> { %v2405_v12 = vpop.eup %2404  ;;  %1177 = vmin.xlane.f32.xlu0 %v1176_v26  ;;  %902 = vadd.xlane.f32.xlu1 %v901_v43  ;;  %v878_v48 = vmul.f32 1.442695, %v821_v20  ;;  %v3298_v4 = vpop.xlane.xlu0 %725  ;;  %v955_v22 = vsel %vm699_vm0, %v2403_v59, 0.0  ;;  %v872_v26 = vmul.f32 1.442695, %v818_v5  ;;  %v802_v43 = vsub.f32 %v3089_v52, %v3275_v24 }
 0x122   : >> { %v3301_v9 = vpop.xlane.xlu1 %728  ;;  %v940_v6 = vsel %vm699_vm0, %v2405_v12, 0.0  ;;  %v1134_v52 = vsel %vm699_vm0, %v1090_v3, inf  ;;  %vm1060_vm3 = vcmp.eq.f32.partialorder %v3109_v42, %v3298_v4 }
 0x123   : >> { %2418 = vpow2.f32 %v878_v48  ;;  %v805_v0 = vsub.f32 %v3112_v41, %v3301_v9  ;;  %v840_v10 = vmul.f32 1.442695, %v802_v43  ;;  %vm1061_vm5 = vcmp.eq.f32.partialorder %v3112_v41, %v3301_v9 }
 0x124   : >> { %v2407_v28 = vpop.eup %2406  ;;  %2420 = vpow2.f32 %v868_v1  ;;  %v1093_v8 = vsel %vm1061_vm5, %v4682_v19, 16.0 }
 0x125   : >> { %v2409_v50 = vpop.eup %2408  ;;  %941 = vadd.xlane.f32.xlu0 %v940_v6  ;;  %956 = vadd.xlane.f32.xlu1 %v955_v22  ;;  %v846_v33 = vmul.f32 1.442695, %v805_v0  ;;  %v3308_v20 = vpop.xlane.xlu0 %779  ;;  %2422 = vpow2.f32 %v836_v32  ;;  %v907_v59 = vsel %vm699_vm0, %v2407_v28, 0.0  ;;  %v820_v22 = vsub.f32 %v3099_v54, %v3286_v35 }
 0x126   : >> { %v3311_v48 = vpop.xlane.xlu1 %782  ;;  %v892_v6 = vsel %vm699_vm0, %v2409_v50, 0.0  ;;  %v1188_v54 = vsel %vm699_vm0, %v1108_v39, inf  ;;  %vm1078_vm6 = vcmp.eq.f32.partialorder %v3119_v56, %v3308_v20  ;;  %v1143_v41 = vsel %vm699_vm0, %v1093_v8, inf  ;;  %v4735_v39 = vld [vmem:[#allocation55_spill] sm:$0xff] }
 0x127   : >> { %2424 = vpow2.f32 %v846_v33  ;;  %v823_v1 = vsub.f32 %v3122_v29, %v3311_v48  ;;  %v876_v43 = vmul.f32 1.442695, %v820_v22  ;;  %vm1079_vm8 = vcmp.eq.f32.partialorder %v3122_v29, %v3311_v48 }
 0x128   : >> { %v2411_v12 = vpop.eup %2410  ;;  %2426 = vpow2.f32 %v872_v26 }
 0x129   : >> { %v2413_v5 = vpop.eup %2412  ;;  %893 = vadd.xlane.f32.xlu0 %v892_v6  ;;  %908 = vadd.xlane.f32.xlu1 %v907_v59  ;;  %v882_v32 = vmul.f32 1.442695, %v823_v1  ;;  %v961_v0 = vsel %vm699_vm0, %v2411_v12, 0.0  ;;  %v3323_v11 = vpop.xlane.xlu0 %731  ;;  %v804_v59 = vsub.f32 %v3109_v42, %v3298_v4  ;;  %v1109_v4 = vsel %vm1077_vm4, %v4682_v19, 16.0 }
 0x12a   : >> { %v3319_v28 = vpop.xlane.xlu1 %734  ;;  %v946_v26 = vsel %vm699_vm0, %v2413_v5, 0.0  ;;  %v1191_v27 = vsel %vm699_vm0, %v1109_v4, inf  ;;  %vm1062_vm7 = vcmp.eq.f32.partialorder %v3129_v36, %v3323_v11 }
 0x12b   : >> { %2428 = vpow2.f32 %v882_v32  ;;  %v807_v33 = vsub.f32 %v3132_v31, %v3319_v28  ;;  %vm1063_vm9 = vcmp.eq.f32.partialorder %v3132_v31, %v3319_v28 }
 0x12c   : >> { %v2415_v50 = vpop.eup %2414  ;;  %2430 = vpow2.f32 %v840_v10  ;;  %v844_v10 = vmul.f32 1.442695, %v804_v59 }
 0x12d   : >> { %v2417_v6 = vpop.eup %2416  ;;  %947 = vadd.xlane.f32.xlu0 %v946_v26  ;;  %962 = vadd.xlane.f32.xlu1 %v961_v0  ;;  %v850_v1 = vmul.f32 1.442695, %v807_v33  ;;  %v913_v12 = vsel %vm699_vm0, %v2415_v50, 0.0  ;;  %v3334_v26 = vpop.xlane.xlu0 %785  ;;  %v822_v0 = vsub.f32 %v3119_v56, %v3308_v20  ;;  %v1094_v20 = vsel %vm1062_vm7, %v4682_v19, 16.0 }
 0x12e   : >> { %v3329_v32 = vpop.xlane.xlu1 %788  ;;  %v898_v5 = vsel %vm699_vm0, %v2417_v6, 0.0 }
 0x12f   : >> { %2432 = vpow2.f32 %v850_v1  ;;  %v825_v13 = vsub.f32 %v3142_v55, %v3329_v32  ;;  %vm1081_vm12 = vcmp.eq.f32.partialorder %v3142_v55, %v3329_v32 }
 0x130   : >> { %v2419_v14 = vpop.eup %2418  ;;  %2434 = vpow2.f32 %v876_v43 }
 0x131   : >> { %v2421_v37 = vpop.eup %2420  ;;  %899 = vadd.xlane.f32.xlu0 %v898_v5  ;;  %914 = vadd.xlane.f32.xlu1 %v913_v12  ;;  %v886_v22 = vmul.f32 1.442695, %v825_v13  ;;  %v967_v33 = vsel %vm699_vm0, %v2419_v14, 0.0  ;;  %v880_v12 = vmul.f32 1.442695, %v822_v0  ;;  %v806_v14 = vsub.f32 %v3129_v36, %v3323_v11 }
 0x132   : >> { %v3339_v50 = vpop.xlane.xlu1 %740  ;;  %v2423_v1 = vpop.eup %2422  ;;  %v952_v43 = vsel %vm699_vm0, %v2421_v37, 0.0  ;;  %v1146_v11 = vsel %vm699_vm0, %v1094_v20, inf  ;;  %v1111_v36 = vsel %vm1079_vm8, %v4682_v19, 16.0  ;;  %v4746_v20 = vld [vmem:[#allocation101_spill] sm:$0xff] }
 0x133   : >> { %2436 = vpow2.f32 %v886_v22  ;;  %v809_v6 = vsub.f32 %v3154_v25, %v3339_v50  ;;  %v904_v5 = vsel %vm699_vm0, %v2423_v1, 0.0  ;;  %v3352_v37 = vpop.xlane.xlu0 %737  ;;  %v1197_v29 = vsel %vm699_vm0, %v1111_v36, inf  ;;  %v4748_v36 = vld [vmem:[#allocation69_spill] sm:$0xff] }
 0x134   : >> { %v2425_v38 = vpop.eup %2424  ;;  %2438 = vpow2.f32 %v844_v10  ;;  %vm1065_vm13 = vcmp.eq.f32.partialorder %v3154_v25, %v3339_v50 }
 0x135   : >> { %953 = vadd.xlane.f32.xlu0 %v952_v43  ;;  %968 = vadd.xlane.f32.xlu1 %v967_v33  ;;  %v854_v13 = vmul.f32 1.442695, %v809_v6  ;;  %v2427_v59 = vpop.eup %2426  ;;  %v919_v40 = vsel %vm699_vm0, %v2425_v38, 0.0  ;;  %v848_v6 = vmul.f32 1.442695, %v806_v14  ;;  %v824_v38 = vsub.f32 %v3139_v2, %v3334_v26 }
 0x136   : >> { %v3348_v22 = vpop.xlane.xlu1 %794  ;;  %v958_v33 = vsel %vm699_vm0, %v2427_v59, 0.0  ;;  %v808_v14 = vsub.f32 %v3150_v58, %v3352_v37  ;;  %v1097_v32 = vsel %vm1065_vm13, %v4682_v19, 16.0  ;;  %vm4572_vm13 = vcmask 15360  }
 0x137   : >> { %2440 = vpow2.f32 %v854_v13  ;;  %v827_v45 = vsub.f32 %v3166_v62, %v3348_v22  ;;  %v1155_v25 = vsel %vm699_vm0, %v1097_v32, inf }
 0x138   : >> { %v2429_v10 = vpop.eup %2428  ;;  %2442 = vpow2.f32 %v880_v12 }
 0x139   : >> { %905 = vadd.xlane.f32.xlu0 %v904_v5  ;;  %920 = vadd.xlane.f32.xlu1 %v919_v40  ;;  %v890_v0 = vmul.f32 1.442695, %v827_v45  ;;  %v2431_v1 = vpop.eup %2430  ;;  %v973_v43 = vsel %vm699_vm0, %v2429_v10, 0.0  ;;  %v3363_v45 = vpop.xlane.xlu0 %791  ;;  %v884_v5 = vmul.f32 1.442695, %v824_v38 }
 0x13a   : >> { %v3358_v13 = vpop.xlane.xlu1 %746  ;;  %v910_v59 = vsel %vm699_vm0, %v2431_v1, 0.0  ;;  %v852_v1 = vmul.f32 1.442695, %v808_v14  ;;  %vm1082_vm14 = vcmp.eq.f32.partialorder %v3163_v23, %v3363_v45 }
 0x13b   : >> { %2444 = vpow2.f32 %v890_v0  ;;  %v811_v62 = vsub.f32 %v3180_v17, %v3358_v13 }
 0x13c   : >> { %v2433_v57 = vpop.eup %2432  ;;  %2446 = vpow2.f32 %v848_v6 }
 0x13d   : >> { %959 = vadd.xlane.f32.xlu0 %v958_v33  ;;  %974 = vadd.xlane.f32.xlu1 %v973_v43  ;;  %v858_v40 = vmul.f32 1.442695, %v811_v62  ;;  %v2435_v12 = vpop.eup %2434  ;;  %v925_v10 = vsel %vm699_vm0, %v2433_v57, 0.0  ;;  %v826_v43 = vsub.f32 %v3163_v23, %v3363_v45  ;;  %v3372_v38 = vpop.xlane.xlu0 %743 }
 0x13e   : >> { %v964_v17 = vsel %vm699_vm0, %v2435_v12, 0.0  ;;  %vm1066_vm1 = vcmp.eq.f32.partialorder %v3177_v18, %v3372_v38 }
 0x13f   : >> { %2448 = vpow2.f32 %v858_v40  ;;  %v810_v40 = vsub.f32 %v3177_v18, %v3372_v38  ;;  %v1098_v45 = vsel %vm1066_vm1, %v4682_v19, 16.0 }
 0x140   : >> { %v2437_v0 = vpop.eup %2436  ;;  %2450 = vpow2.f32 %v884_v5  ;;  %v1158_v18 = vsel %vm699_vm0, %v1098_v45, inf }
 0x141   : >> { %911 = vadd.xlane.f32.xlu0 %v910_v59  ;;  %926 = vadd.xlane.f32.xlu1 %v925_v10  ;;  %v2439_v33 = vpop.eup %2438  ;;  %v979_v6 = vsel %vm699_vm0, %v2437_v0, 0.0  ;;  %2452 = vpow2.f32 %v852_v1  ;;  %v888_v59 = vmul.f32 1.442695, %v826_v43  ;;  %v856_v10 = vmul.f32 1.442695, %v810_v40  ;;  %v4705_v40 = vld [vmem:[#allocation80_spill] sm:$0xff] }
 0x142   : >> { %v916_v57 = vsel %vm699_vm0, %v2439_v33, 0.0  ;;  %v1234_v1 = vmul.f32 %v3168_v61, %v4703_v15  ;;  %v1235_v43 = vmul.f32 %v3170_v30, %v4704_v16  ;;  %v4707_v15 = vld [vmem:[#allocation14_spill] sm:$0xff] }
 0x143   : >> { %2454 = vpow2.f32 %v888_v59 }
 0x144   : >> { %v2441_v62 = vpop.eup %2440  ;;  %2456 = vpow2.f32 %v856_v10  ;;  %v1302_v59 = vadd.f32 %v1235_v43, %v1234_v1 }
 0x145   : >> { %965 = vadd.xlane.f32.xlu0 %v964_v17  ;;  %980 = vadd.xlane.f32.xlu1 %v979_v6  ;;  %v931_v12 = vsel %vm699_vm0, %v2441_v62, 0.0  ;;  %v2443_v5 = vpop.eup %2442 }
 0x146   : >> { %v970_v0 = vsel %vm699_vm0, %v2443_v5, 0.0  ;;  %v4706_v5 = vld [vmem:[#allocation81_spill] sm:$0xff] }
 0x148   : >> { %v2445_v14 = vpop.eup %2444 }
 0x149   : >> { %917 = vadd.xlane.f32.xlu0 %v916_v57  ;;  %932 = vadd.xlane.f32.xlu1 %v931_v12  ;;  %v985_v17 = vsel %vm699_vm0, %v2445_v14, 0.0  ;;  %v2447_v63 = vpop.eup %2446  ;;  %v1268_v12 = vmul.f32 %v3168_v61, %v4705_v40  ;;  %v1269_v14 = vmul.f32 %v3170_v30, %v4706_v5  ;;  %v4709_v40 = vld [vmem:[#allocation82_spill] sm:$0xff] }
 0x14a   : >> { %v922_v6 = vsel %vm699_vm0, %v2447_v63, 0.0  ;;  %v1236_v63 = vmul.f32 %v3168_v61, %v4707_v15  ;;  %v1270_v5 = vmul.f32 %v3168_v61, %v4709_v40  ;;  %v4714_v40 = vld [vmem:[#allocation85_spill] sm:$0xff] }
 0x14b   : >> { %v1353_v10 = vadd.f32 %v1269_v14, %v1268_v12  ;;  %v4711_v14 = vld [vmem:[#allocation20_spill] sm:$0xff] }
 0x14c   : >> { %v2449_v33 = vpop.eup %2448 }
 0x14d   : >> { %971 = vadd.xlane.f32.xlu0 %v970_v0  ;;  %986 = vadd.xlane.f32.xlu1 %v985_v17  ;;  %v937_v62 = vsel %vm699_vm0, %v2449_v33, 0.0  ;;  %v2451_v57 = vpop.eup %2450  ;;  %v4708_v33 = vld [vmem:[#allocation15_spill] sm:$0xff] }
 0x14e   : >> { %v976_v0 = vsel %vm699_vm0, %v2451_v57, 0.0  ;;  %v2453_v17 = vpop.eup %2452  ;;  %v4710_v57 = vld [vmem:[#allocation83_spill] sm:$0xff] }
 0x14f   : >> { %v928_v1 = vsel %vm699_vm0, %v2453_v17, 0.0  ;;  %v4712_v17 = vld [vmem:[#allocation21_spill] sm:$0xff] }
 0x150   : >> { %v2455_v43 = vpop.eup %2454 }
 0x151   : >> { %923 = vadd.xlane.f32.xlu0 %v922_v6  ;;  %938 = vadd.xlane.f32.xlu1 %v937_v62  ;;  %v1237_v6 = vmul.f32 %v3170_v30, %v4708_v33  ;;  %v2457_v12 = vpop.eup %2456  ;;  %v1238_v33 = vmul.f32 %v3168_v61, %v4711_v14 }
 0x153   : >> { %v1305_v62 = vadd.f32 %v1237_v6, %v1236_v63  ;;  %v1088_v63 = vsel %vm1056_vm10, %v4682_v19, 16.0  ;;  %vm1080_vm10 = vcmp.eq.f32.partialorder %v3139_v2, %v3334_v26 }
 0x154   : >> { %v1112_v28 = vsel %vm1080_vm10, %v4682_v19, 16.0 }
 0x155   : >> { %977 = vadd.xlane.f32.xlu0 %v976_v0  ;;  %1303 = vadd.xlane.f32.xlu1 %v1302_v59  ;;  %v1271_v0 = vmul.f32 %v3170_v30, %v4710_v57  ;;  %v982_v59 = vsel %vm699_vm0, %v2455_v43, 0.0  ;;  %v4713_v43 = vld [vmem:[#allocation84_spill] sm:$0xff]  ;;  %v1128_v57 = vsel %vm699_vm0, %v1088_v63, inf  ;;  %v1200_v2 = vsel %vm699_vm0, %v1112_v28, inf  ;;  %v4750_v28 = vld [vmem:[#allocation42_spill] sm:$0xff] }
 0x157   : >> { %v1356_v15 = vadd.f32 %v1271_v0, %v1270_v5  ;;  %v1273_v5 = vmul.f32 %v3170_v30, %v4714_v40  ;;  %v1105_v0 = vsel %vm1073_vm11, %v4682_v19, 16.0  ;;  %v4720_v40 = vld [vmem:[#allocation32_spill] sm:$0xff]  ;;  %vm1064_vm11 = vcmp.eq.f32.partialorder %v3150_v58, %v3352_v37 }
 0x158   : >> { %v1179_v14 = vsel %vm699_vm0, %v1105_v0, inf  ;;  %v1096_v26 = vsel %vm1064_vm11, %v4682_v19, 16.0  ;;  %v1113_v37 = vsel %vm1081_vm12, %v4682_v19, 16.0  ;;  %vm1820_vm11 = vcmask 7168  }
 0x159   : >> { %929 = vadd.xlane.f32.xlu0 %v928_v1  ;;  %1354 = vadd.xlane.f32.xlu1 %v1353_v10  ;;  %v1239_v1 = vmul.f32 %v3170_v30, %v4712_v17  ;;  %v934_v10 = vsel %vm699_vm0, %v2457_v12, 0.0  ;;  %v4716_v12 = vld [vmem:[#allocation27_spill] sm:$0xff]  ;;  %v4717_v17 = vld [vmem:[#allocation86_spill] sm:$0xff]  ;;  %v1152_v58 = vsel %vm699_vm0, %v1096_v26, inf  ;;  %v1203_v55 = vsel %vm699_vm0, %v1113_v37, inf }
 0x15b   : >> { %v1308_v6 = vadd.f32 %v1239_v1, %v1238_v33  ;;  %v3424_v33 = vpop.xlane.xlu1 %1339  ;;  %v1274_v1 = vmul.f32 %v3168_v61, %v4717_v17  ;;  %v4724_v17 = vld [vmem:[#allocation38_spill] sm:$0xff] }
 0x15d   : >> { %983 = vadd.xlane.f32.xlu0 %v982_v59  ;;  %1306 = vadd.xlane.f32.xlu1 %v1305_v62  ;;  %v1272_v62 = vmul.f32 %v3168_v61, %v4713_v43  ;;  %v1240_v59 = vmul.f32 %v3168_v61, %v4715_v34  ;;  %v4719_v43 = vld [vmem:[#allocation28_spill] sm:$0xff] }
 0x15f   : >> { %v1359_v53 = vadd.f32 %v1273_v5, %v1272_v62  ;;  %v1242_v62 = vmul.f32 %v3168_v61, %v4719_v43  ;;  %v1243_v5 = vmul.f32 %v3170_v30, %v4720_v40  ;;  %v4727_v40 = vld [vmem:[#allocation43_spill] sm:$0xff] }
 0x161   : >> { %935 = vadd.xlane.f32.xlu0 %v934_v10  ;;  %1357 = vadd.xlane.f32.xlu1 %v1356_v15  ;;  %v1241_v15 = vmul.f32 %v3170_v30, %v4716_v12  ;;  %v4718_v10 = vld [vmem:[#allocation87_spill] sm:$0xff]  ;;  %v1314_v0 = vadd.f32 %v1243_v5, %v1242_v62  ;;  %v1246_v5 = vmul.f32 %v3168_v61, %v4727_v40  ;;  %v4736_v40 = vld [vmem:[#allocation60_spill] sm:$0xff] }
 0x162   : >> { %v1275_v63 = vmul.f32 %v3170_v30, %v4718_v10 }
 0x163   : >> { %v1311_v44 = vadd.f32 %v1241_v15, %v1240_v59  ;;  %v4722_v59 = vld [vmem:[#allocation89_spill] sm:$0xff]  ;;  %v1107_v15 = vsel %vm1075_vm15, %v4682_v19, 16.0 }
 0x164   : >> { %v1277_v12 = vmul.f32 %v3170_v30, %v4722_v59  ;;  %v1185_v51 = vsel %vm699_vm0, %v1107_v15, inf }
 0x165   : >> { %1129 = vmin.xlane.f32.xlu0 %v1128_v57  ;;  %1309 = vadd.xlane.f32.xlu1 %v1308_v6  ;;  %v1362_v6 = vadd.f32 %v1275_v63, %v1274_v1  ;;  %v3441_v57 = vpop.xlane.xlu1 %1291  ;;  %v1245_v1 = vmul.f32 %v3170_v30, %v4724_v17  ;;  %v4725_v63 = vld [vmem:[#allocation90_spill] sm:$0xff] }
 0x169   : >> { %1180 = vmin.xlane.f32.xlu0 %v1179_v14  ;;  %1360 = vadd.xlane.f32.xlu1 %v1359_v53  ;;  %v4721_v53 = vld [vmem:[#allocation88_spill] sm:$0xff]  ;;  %v3452_v24 = vpop.xlane.xlu1 %1342 }
 0x16a   : >> { %v1276_v34 = vmul.f32 %v3168_v61, %v4721_v53 }
 0x16c   : >> { %v1365_v14 = vadd.f32 %v1277_v12, %v1276_v34  ;;  %v4729_v34 = vld [vmem:[#allocation92_spill] sm:$0xff]  ;;  %v4730_v12 = vld [vmem:[#allocation93_spill] sm:$0xff] }
 0x16d   : >> { %1132 = vmin.xlane.f32.xlu0 %v1131_v46  ;;  %1312 = vadd.xlane.f32.xlu1 %v1311_v44  ;;  %v1244_v44 = vmul.f32 %v3168_v61, %v4723_v49  ;;  %v1278_v46 = vmul.f32 %v3168_v61, %v4725_v63  ;;  %v3469_v43 = vpop.xlane.xlu1 %1294  ;;  %v1280_v59 = vmul.f32 %v3168_v61, %v4729_v34  ;;  %v4734_v63 = vld [vmem:[#allocation95_spill] sm:$0xff] }
 0x16f   : >> { %v1317_v10 = vadd.f32 %v1245_v1, %v1244_v44  ;;  %v4732_v44 = vld [vmem:[#allocation54_spill] sm:$0xff] }
 0x170   : >> { %v1249_v17 = vmul.f32 %v3170_v30, %v4732_v44  ;;  %v1095_v44 = vsel %vm1063_vm9, %v4682_v19, 16.0 }
 0x171   : >> { %1183 = vmin.xlane.f32.xlu0 %v1182_v21  ;;  %1363 = vadd.xlane.f32.xlu1 %v1362_v6  ;;  %v1279_v6 = vmul.f32 %v3170_v30, %v4726_v60  ;;  %v4728_v21 = vld [vmem:[#allocation48_spill] sm:$0xff]  ;;  %v3480_v35 = vpop.xlane.xlu1 %1345  ;;  %v1149_v31 = vsel %vm699_vm0, %v1095_v44, inf }
 0x172   : >> { %v1247_v3 = vmul.f32 %v3170_v30, %v4728_v21 }
 0x173   : >> { %v1368_v62 = vadd.f32 %v1279_v6, %v1278_v46  ;;  %v1283_v46 = vmul.f32 %v3170_v30, %v4734_v63  ;;  %v1110_v6 = vsel %vm1078_vm6, %v4682_v19, 16.0 }
 0x174   : >> { %v1320_v53 = vadd.f32 %v1247_v3, %v1246_v5  ;;  %v1251_v5 = vmul.f32 %v3170_v30, %v4736_v40  ;;  %v1194_v56 = vsel %vm699_vm0, %v1110_v6, inf  ;;  %v4744_v6 = vld [vmem:[#allocation67_spill] sm:$0xff] }
 0x175   : >> { %1135 = vmin.xlane.f32.xlu0 %v1134_v52  ;;  %1315 = vadd.xlane.f32.xlu1 %v1314_v0  ;;  %v1092_v0 = vsel %vm1060_vm3, %v4682_v19, 16.0  ;;  %v1281_v52 = vmul.f32 %v3170_v30, %v4730_v12  ;;  %v3497_v1 = vpop.xlane.xlu1 %1297 }
 0x176   : >> { %v1140_v42 = vsel %vm699_vm0, %v1092_v0, inf }
 0x177   : >> { %v1371_v15 = vadd.f32 %v1281_v52, %v1280_v59 }
 0x179   : >> { %1186 = vmin.xlane.f32.xlu0 %v1185_v51  ;;  %1366 = vadd.xlane.f32.xlu1 %v1365_v14  ;;  %v4731_v14 = vld [vmem:[#allocation49_spill] sm:$0xff]  ;;  %v3510_v9 = vpop.xlane.xlu1 %1348 }
 0x17a   : >> { %v1248_v49 = vmul.f32 %v3168_v61, %v4731_v14 }
 0x17c   : >> { %v1323_v51 = vadd.f32 %v1249_v17, %v1248_v49 }
 0x17d   : >> { %1138 = vmin.xlane.f32.xlu0 %v1137_v47  ;;  %1318 = vadd.xlane.f32.xlu1 %v1317_v10  ;;  %v1282_v10 = vmul.f32 %v3168_v61, %v4733_v7  ;;  %v3531_v12 = vpop.xlane.xlu1 %1300 }
 0x17f   : >> { %v1374_v47 = vadd.f32 %v1283_v46, %v1282_v10  ;;  %v4743_v46 = vld [vmem:[#allocation66_spill] sm:$0xff] }
 0x181   : >> { %1189 = vmin.xlane.f32.xlu0 %v1188_v54  ;;  %1369 = vadd.xlane.f32.xlu1 %v1368_v62  ;;  %v1250_v62 = vmul.f32 %v3168_v61, %v4735_v39  ;;  %v4737_v54 = vld [vmem:[#allocation96_spill] sm:$0xff]  ;;  %v3544_v48 = vpop.xlane.xlu1 %1351 }
 0x182   : >> { %v1284_v0 = vmul.f32 %v3168_v61, %v4737_v54 }
 0x183   : >> { %v1326_v3 = vadd.f32 %v1251_v5, %v1250_v62  ;;  %v4745_v5 = vld [vmem:[#allocation100_spill] sm:$0xff] }
 0x185   : >> { %1141 = vmin.xlane.f32.xlu0 %v1140_v42  ;;  %1321 = vadd.xlane.f32.xlu1 %v1320_v53  ;;  %v4738_v53 = vld [vmem:[#allocation97_spill] sm:$0xff] }
 0x186   : >> { %v1285_v34 = vmul.f32 %v3170_v30, %v4738_v53  ;;  %v4739_v42 = vld [vmem:[#allocation61_spill] sm:$0xff] }
 0x187   : >> { %v1252_v4 = vmul.f32 %v3168_v61, %v4739_v42 }
 0x188   : >> { %v1377_v52 = vadd.f32 %v1285_v34, %v1284_v0  ;;  %v4747_v34 = vld [vmem:[#allocation68_spill] sm:$0xff] }
 0x189   : >> { %1192 = vmin.xlane.f32.xlu0 %v1191_v27  ;;  %1372 = vadd.xlane.f32.xlu1 %v1371_v15  ;;  %v4740_v15 = vld [vmem:[#allocation65_spill] sm:$0xff]  ;;  %v4741_v27 = vld [vmem:[#allocation98_spill] sm:$0xff] }
 0x18a   : >> { %v3505_v60 = vpop.xlane.xlu0 %1165  ;;  %v1253_v14 = vmul.f32 %v3170_v30, %v4740_v15  ;;  %v1286_v8 = vmul.f32 %v3168_v61, %v4741_v27 }
 0x18b   : >> { %vm1402_vm10 = vcmp.eq.f32.partialorder %v3505_v60, %v3424_v33 }
 0x18c   : >> { %v1329_v17 = vadd.f32 %v1253_v14, %v1252_v4 }
 0x18d   : >> { %1144 = vmin.xlane.f32.xlu0 %v1143_v41  ;;  %1324 = vadd.xlane.f32.xlu1 %v1323_v51  ;;  %v4742_v51 = vld [vmem:[#allocation99_spill] sm:$0xff]  ;;  %v1254_v41 = vmul.f32 %v3168_v61, %v4743_v46 }
 0x18e   : >> { %v3517_v21 = vpop.xlane.xlu0 %1117  ;;  %v1287_v7 = vmul.f32 %v3170_v30, %v4742_v51  ;;  %v2523_v51 = vld [vmem:[%s3016_s8 + $0x78] sm:$0xff] }
 0x18f   : >> { %vm1067_vm3 = vcmp.eq.f32.partialorder %v2523_v51, %v3358_v13  ;;  %v4751_v13 = vld [vmem:[#allocation17_spill] sm:$0xff]  ;;  %vm1386_vm1 = vcmp.eq.f32.partialorder %v3517_v21, %v3441_v57 }
 0x190   : >> { %v1380_v63 = vadd.f32 %v1287_v7, %v1286_v8  ;;  %v3607_v8 = vstv %s1482_s16  ;;  %v4749_v7 = vld [vmem:[#allocation44_spill] sm:$0xff] }
 0x191   : >> { %1195 = vmin.xlane.f32.xlu0 %v1194_v56  ;;  %1375 = vadd.xlane.f32.xlu1 %v1374_v47  ;;  %v1255_v47 = vmul.f32 %v3170_v30, %v4744_v6  ;;  %v1288_v56 = vmul.f32 %v3168_v61, %v4745_v5  ;;  %v1099_v6 = vsel %vm1067_vm3, %v4682_v19, 16.0 }
 0x192   : >> { %v3527_v59 = vpop.xlane.xlu0 %1168 }
 0x193   : >> { %v1332_v40 = vadd.f32 %v1255_v47, %v1254_v41 }
 0x195   : >> { %1147 = vmin.xlane.f32.xlu0 %v1146_v11  ;;  %1327 = vadd.xlane.f32.xlu1 %v1326_v3  ;;  %v1289_v3 = vmul.f32 %v3170_v30, %v4746_v20  ;;  %v1256_v11 = vmul.f32 %v3168_v61, %v4747_v34  ;;  %v1161_v34 = vsel %vm699_vm0, %v1099_v6, inf }
 0x196   : >> { %v3539_v49 = vpop.xlane.xlu0 %1120 }
 0x197   : >> { %v1383_v53 = vadd.f32 %v1289_v3, %v1288_v56  ;;  %v4753_v56 = vld [vmem:[#allocation46_spill] sm:$0xff]  ;;  %v4754_v3 = vld [vmem:[#allocation19_spill] sm:$0xff] }
 0x198   : >> { %v1503_v20 = vadd.s32 %v3607_v8, %v4753_v56 }
 0x199   : >> { %1198 = vmin.xlane.f32.xlu0 %v1197_v29  ;;  %1378 = vadd.xlane.f32.xlu1 %v1377_v52  ;;  %v1257_v52 = vmul.f32 %v3170_v30, %v4748_v36  ;;  %v1114_v30 = vsel %vm1082_vm14, %v4682_v19, 16.0  ;;  %vm1403_vm14 = vcmp.eq.f32.partialorder %v3527_v59, %v3452_v24 }
 0x19a   : >> { %v3551_v10 = vpop.xlane.xlu0 %1171  ;;  %v1206_v23 = vsel %vm699_vm0, %v1114_v30, inf  ;;  %vm1535_vm8 = vcmp.lt.s32.totalorder %v1503_v20, 1500 }
 0x19b   : >> { %v1335_v15 = vadd.f32 %v1257_v52, %v1256_v11  ;;  %v4757_v52 = vld [vmem:[#allocation18_spill] sm:$0xff] }
 0x19d   : >> { %1150 = vmin.xlane.f32.xlu0 %v1149_v31  ;;  %1330 = vadd.xlane.f32.xlu1 %v1329_v17  ;;  %v2522_v17 = vld [vmem:[%s3016_s8 + $0xf8] sm:$0xff]  ;;  %v1501_v31 = vadd.s32 %v3607_v8, %v4749_v7  ;;  %v4570_v7 = vmov 0.0  }
 0x19e   : >> { %v3561_v39 = vpop.xlane.xlu0 %1123  ;;  %v945_v62 = vpop.xlane.xlu1 %944  ;;  %vm1083_vm2 = vcmp.eq.f32.partialorder %v2522_v17, %v3348_v22  ;;  %v2182_v33 = vsel %vm1403_vm14, 1.0, %v4570_v7  ;;  %v2165_v59 = vsel %vm1386_vm1, 1.0, %v4570_v7 }
 0x19f   : >> { %2458 = vrcp.f32 %v945_v62  ;;  %v1115_v38 = vsel %vm1083_vm2, %v4682_v19, 16.0  ;;  %vm1533_vm4 = vcmp.lt.s32.totalorder %v1501_v31, 1500  ;;  %v1485_v62 = vadd.s32 %v3607_v8, %v4751_v13 }
 0x1a0   : >> { %v1209_v41 = vsel %vm699_vm0, %v1115_v38, inf  ;;  %v2181_v31 = vsel %vm1402_vm10, 1.0, %v4570_v7  ;;  %vm1387_vm2 = vcmp.eq.f32.partialorder %v3539_v49, %v3469_v43 }
 0x1a1   : >> { %1201 = vmin.xlane.f32.xlu0 %v1200_v2  ;;  %1381 = vadd.xlane.f32.xlu1 %v1380_v63  ;;  %v1500_v63 = vadd.s32 %v3607_v8, %v4750_v28  ;;  %v4752_v2 = vld [vmem:[#allocation9_spill] sm:$0xff]  ;;  %vm1517_vm6 = vcmp.lt.s32.totalorder %v1485_v62, 1500  ;;  %v4759_v28 = vld [vmem:[#allocation47_spill] sm:$0xff]  ;;  %v2166_v20 = vsel %vm1387_vm2, 1.0, %v4570_v7 }
 0x1a2   : >> { %v3571_v54 = vpop.xlane.xlu0 %1174  ;;  %v897_v0 = vpop.xlane.xlu1 %896  ;;  %v1484_v26 = vadd.s32 %v3607_v8, %v4752_v2 }
 0x1a3   : >> { %vm1532_vm5 = vcmp.lt.s32.totalorder %v1500_v63, 1500  ;;  %v1504_v63 = vadd.s32 %v3607_v8, %v4759_v28 }
 0x1a4   : >> { %vm1516_vm7 = vcmp.lt.s32.totalorder %v1484_v26, 1500 }
 0x1a5   : >> { %1153 = vmin.xlane.f32.xlu0 %v1152_v58  ;;  %1333 = vadd.xlane.f32.xlu1 %v1332_v40  ;;  %v4755_v58 = vld [vmem:[#allocation45_spill] sm:$0xff] }
 0x1a6   : >> { %v3581_v42 = vpop.xlane.xlu0 %1126  ;;  %v951_v4 = vpop.xlane.xlu1 %950  ;;  %v1502_v37 = vadd.s32 %v3607_v8, %v4755_v58 }
 0x1a8   : >> { %vm1534_vm9 = vcmp.lt.s32.totalorder %v1502_v37, 1500 }
 0x1a9   : >> { %1204 = vmin.xlane.f32.xlu0 %v1203_v55  ;;  %1384 = vadd.xlane.f32.xlu1 %v1383_v53 }
 0x1aa   : >> { %v3587_v14 = vpop.xlane.xlu0 %1177  ;;  %v903_v61 = vpop.xlane.xlu1 %902 }
 0x1ab   : >> { %vm1406_vm15 = vcmp.eq.f32.partialorder %v3587_v14, %v3544_v48 }
 0x1ac   : >> { %v2459_v47 = vpop.eup %2458 }
 0x1ad   : >> { %1156 = vmin.xlane.f32.xlu0 %v1155_v25  ;;  %1336 = vadd.xlane.f32.xlu1 %v1335_v15  ;;  %v3636_v11 = vsel %vm1533_vm4, %v2459_v47, -1.0  ;;  %vm1404_vm4 = vcmp.eq.f32.partialorder %v3551_v10, %v3480_v35 }
 0x1ae   : >> { %v942_v50 = vpop.xlane.xlu0 %941  ;;  %v957_v29 = vpop.xlane.xlu1 %956 }
 0x1af   : >> { %2460 = vrcp.f32 %v942_v50 }
 0x1b0   : >> { %2462 = vrcp.f32 %v897_v0  ;;  %v3631_v0 = vadd.s32 %v3607_v8, %v4754_v3 }
 0x1b1   : >> { %1207 = vmin.xlane.f32.xlu0 %v1206_v23 }
 0x1b2   : >> { %v894_v44 = vpop.xlane.xlu0 %893  ;;  %v3605_v27 = vpop.xlane.xlu1 %908  ;;  %vm1519_vm0 = vcmp.lt.s32.totalorder %v3631_v0, 1500 }
 0x1b3   : >> { %2464 = vrcp.f32 %v894_v44 }
 0x1b4   : >> { %2466 = vrcp.f32 %v951_v4  ;;  %v1486_v4 = vadd.s32 %v3607_v8, %v4757_v52 }
 0x1b5   : >> { %1159 = vmin.xlane.f32.xlu0 %v1158_v18 }
 0x1b6   : >> { %v948_v22 = vpop.xlane.xlu0 %947  ;;  %v3617_v46 = vpop.xlane.xlu1 %962  ;;  %vm1518_vm12 = vcmp.lt.s32.totalorder %v1486_v4, 1500 }
 0x1b7   : >> { %2468 = vrcp.f32 %v948_v22  ;;  %v4760_v22 = vld [vmem:[#allocation50_spill] sm:$0xff] }
 0x1b8   : >> { %2470 = vrcp.f32 %v903_v61 }
 0x1b9   : >> { %1210 = vmin.xlane.f32.xlu0 %v1209_v41  ;;  %v1505_v41 = vadd.s32 %v3607_v8, %v4760_v22 }
 0x1ba   : >> { %v900_v40 = vpop.xlane.xlu0 %899  ;;  %v3625_v5 = vpop.xlane.xlu1 %914 }
 0x1bb   : >> { %2472 = vrcp.f32 %v900_v40  ;;  %vm1537_vm3 = vcmp.lt.s32.totalorder %v1505_v41, 1500 }
 0x1bc   : >> { %v2461_v53 = vpop.eup %2460  ;;  %2474 = vrcp.f32 %v957_v29 }
 0x1bd   : >> { %v3638_v36 = vsel %vm1532_vm5, %v2461_v53, -1.0  ;;  %1162 = vmin.xlane.f32.xlu0 %v1161_v34  ;;  %v2463_v55 = vpop.eup %2462  ;;  %vm1536_vm5 = vcmp.lt.s32.totalorder %v1504_v63, 1500 }
 0x1be   : >> { %4756 = vst [vmem:[#allocation103_spill] sm:$0xff] %v3638_v36  ;;  %v954_v32 = vpop.xlane.xlu0 %953  ;;  %v3642_v15 = vpop.xlane.xlu1 %968  ;;  %v1748_v61 = vpack.c.bf16 %v3636_v11, %v3638_v36  ;;  %v3649_v29 = vsel %vm1517_vm6, %v2463_v55, -1.0  ;;  %vm1388_vm6 = vcmp.eq.f32.partialorder %v3561_v39, %v3497_v1 }
 0x1bf   : >> { %2476 = vrcp.f32 %v954_v32 }
 0x1c0   : >> { %v2465_v25 = vpop.eup %2464  ;;  %v1772_v30 = vunpack.c.l.bf16 %v1748_v61  ;;  %v1773_v50 = vunpack.c.h.bf16 %v1748_v61  ;;  %2478 = vrcp.f32 %v3605_v27 }
 0x1c1   : >> { %v3651_v23 = vsel %vm1516_vm7, %v2465_v25, -1.0  ;;  %v2467_v51 = vpop.eup %2466  ;;  %vm1405_vm7 = vcmp.eq.f32.partialorder %v3571_v54, %v3510_v9 }
 0x1c2   : >> { %4758 = vst [vmem:[#allocation104_spill] sm:$0xff] %v3651_v23  ;;  %v3655_v45 = vpop.xlane.xlu0 %905  ;;  %v3657_v44 = vpop.xlane.xlu1 %920  ;;  %v1740_v17 = vpack.c.bf16 %v3649_v29, %v3651_v23  ;;  %v1804_v18 = vsub.f32 %v3638_v36, %v1772_v30  ;;  %v1805_v38 = vsub.f32 %v3636_v11, %v1773_v50  ;;  %v3688_v56 = vsel %vm1535_vm8, %v2467_v51, -1.0 }
 0x1c3   : >> { %vm1389_vm8 = vcmp.eq.f32.partialorder %v3581_v42, %v3531_v12  ;;  %v2167_v12 = vsel %vm1388_vm6, 1.0, %v4570_v7  ;;  %2480 = vrcp.f32 %v3655_v45  ;;  %v2184_v63 = vsel %vm1405_vm7, 1.0, %v4570_v7 }
 0x1c4   : >> { %v2469_v6 = vpop.eup %2468  ;;  %v1756_v47 = vunpack.c.l.bf16 %v1740_v17  ;;  %v1837_v13 = vsel %vm1820_vm11, %v1772_v30, %v1804_v18  ;;  %v1757_v62 = vunpack.c.h.bf16 %v1740_v17  ;;  %v1838_v40 = vsel %vm1820_vm11, %v1773_v50, %v1805_v38 }
 0x1c5   : >> { %v2471_v2 = vpop.eup %2470  ;;  %v3681_v60 = vsel %vm1534_vm9, %v2469_v6, -1.0  ;;  %v3684_v26 = vsel %vm4572_vm13, %v1837_v13, %v2181_v31  ;;  %v3693_v24 = vsel %vm4572_vm13, %v1838_v40, %v2182_v33  ;;  %v2183_v50 = vsel %vm1404_vm4, 1.0, %v4570_v7 }
 0x1c6   : >> { %v960_v3 = vpop.xlane.xlu0 %959  ;;  %v975_v58 = vpop.xlane.xlu1 %974  ;;  %v1788_v53 = vsub.f32 %v3651_v23, %v1756_v47  ;;  %v1789_v34 = vsub.f32 %v3649_v29, %v1757_v62  ;;  %v1749_v37 = vpack.c.bf16 %v3688_v56, %v3681_v60  ;;  %v3709_v55 = vsel %vm1519_vm0, %v2471_v2, -1.0 }
 0x1c7   : >> { %v2168_v40 = vsel %vm1389_vm8, 1.0, %v4570_v7  ;;  %2482 = vrcp.f32 %v3617_v46 }
 0x1c8   : >> { %v2473_v52 = vpop.eup %2472  ;;  %v1821_v57 = vsel %vm1820_vm11, %v1756_v47, %v1788_v53  ;;  %v1822_v21 = vsel %vm1820_vm11, %v1757_v62, %v1789_v34  ;;  %v1774_v25 = vunpack.c.l.bf16 %v1749_v37  ;;  %v1775_v18 = vunpack.c.h.bf16 %v1749_v37 }
 0x1c9   : >> { %v2475_v32 = vpop.eup %2474  ;;  %v3714_v43 = vsel %vm1518_vm12, %v2473_v52, -1.0  ;;  %v3717_v49 = vsel %vm4572_vm13, %v1821_v57, %v2165_v59  ;;  %v3720_v61 = vsel %vm4572_vm13, %v1822_v21, %v2166_v20  ;;  %2484 = vrcp.f32 %v3625_v5  ;;  %v4761_v52 = vld [vmem:[#allocation24_spill] sm:$0xff] }
 0x1ca   : >> { %v912_v35 = vpop.xlane.xlu0 %911  ;;  %v927_v10 = vpop.xlane.xlu1 %926  ;;  %v1741_v4 = vpack.c.bf16 %v3709_v55, %v3714_v43  ;;  %v1806_v17 = vsub.f32 %v3681_v60, %v1774_v25  ;;  %v3735_v31 = vsel %vm1537_vm3, %v2475_v32, -1.0  ;;  %v1807_v47 = vsub.f32 %v3688_v56, %v1775_v18  ;;  %v4762_v57 = vld [vmem:[#allocation52_spill] sm:$0xff]  ;;  %v4763_v32 = vld [vmem:[#allocation26_spill] sm:$0xff] }
 0x1cb   : >> { %2486 = vrcp.f32 %v3642_v15  ;;  %v1489_v5 = vadd.s32 %v3607_v8, %v4761_v52  ;;  %v3793_v21 = vadd.s32 %v3607_v8, %v4762_v57  ;;  %v4772_v57 = vld [vmem:[#allocation59_spill] sm:$0xff]  ;;  %v4786_v23 = vpack.i.bf16 %v3717_v49, %v3684_v26 }
 0x1cc   : >> { %v2477_v38 = vpop.eup %2476  ;;  %v1758_v51 = vunpack.c.l.bf16 %v1741_v4  ;;  %v1759_v28 = vunpack.c.h.bf16 %v1741_v4  ;;  %v1839_v6 = vsel %vm1820_vm11, %v1774_v25, %v1806_v17  ;;  %v1840_v27 = vsel %vm1820_vm11, %v1775_v18, %v1807_v47 }
 0x1cd   : >> { %v3740_v22 = vsel %vm1536_vm5, %v2477_v38, -1.0  ;;  %v3749_v2 = vsel %vm4572_vm13, %v1839_v6, %v2183_v50  ;;  %v3777_v34 = vsel %vm4572_vm13, %v1840_v27, %v2184_v63  ;;  %2488 = vrcp.f32 %v960_v3  ;;  %v4765_v38 = vld [vmem:[#allocation51_spill] sm:$0xff]  ;;  %v2479_v6 = vpop.eup %2478 }
 0x1ce   : >> { %v3745_v13 = vpop.xlane.xlu0 %965  ;;  %v981_v62 = vpop.xlane.xlu1 %980  ;;  %v1790_v41 = vsub.f32 %v3714_v43, %v1758_v51  ;;  %v1791_v33 = vsub.f32 %v3709_v55, %v1759_v28  ;;  %v3759_v42 = vpack.c.bf16 %v3735_v31, %v3740_v22  ;;  %2490 = vrcp.f32 %v975_v58  ;;  %v4764_v58 = vld [vmem:[#allocation23_spill] sm:$0xff] }
 0x1cf   : >> { %v3797_v25 = vadd.s32 %v3607_v8, %v4763_v32  ;;  %2492 = vrcp.f32 %v912_v35  ;;  %v2185_v3 = vsel %vm1406_vm15, 1.0, %v4570_v7  ;;  %v1488_v50 = vadd.s32 %v3607_v8, %v4764_v58  ;;  %v4770_v63 = vld [vmem:[#allocation31_spill] sm:$0xff]  ;;  %v4773_v32 = vld [vmem:[#allocation34_spill] sm:$0xff] }
 0x1d0   : >> { %v1823_v53 = vsel %vm1820_vm11, %v1758_v51, %v1790_v41  ;;  %v1824_v1 = vsel %vm1820_vm11, %v1759_v28, %v1791_v33  ;;  %v1776_v20 = vunpack.c.l.bf16 %v3759_v42  ;;  %v3811_v35 = vadd.s32 %v3607_v8, %v4765_v38  ;;  %v4766_v51 = vld [vmem:[#allocation25_spill] sm:$0xff]  ;;  %v2481_v47 = vpop.eup %2480  ;;  %v4767_v41 = vld [vmem:[#allocation56_spill] sm:$0xff] }
 0x1d1   : >> { %v3771_v39 = vsel %vm4572_vm13, %v1823_v53, %v2167_v12  ;;  %v3774_v45 = vsel %vm4572_vm13, %v1824_v1, %v2168_v40  ;;  %v3815_v28 = vadd.s32 %v3607_v8, %v4766_v51  ;;  %vm1521_vm15 = vcmp.lt.s32.totalorder %v1489_v5, 1500  ;;  %v4769_v12 = vld [vmem:[#allocation57_spill] sm:$0xff]  ;;  %v4775_v51 = vld [vmem:[#allocation64_spill] sm:$0xff] }
 0x1d2   : >> { %v3780_v9 = vpop.xlane.xlu0 %917  ;;  %v933_v54 = vpop.xlane.xlu1 %932  ;;  %v1808_v37 = vsub.f32 %v3740_v22, %v1776_v20  ;;  %vm1539_vm0 = vcmp.lt.s32.totalorder %v3793_v21, 1500  ;;  %vm1523_vm9 = vcmp.lt.s32.totalorder %v3797_v25, 1500  ;;  %vm1520_vm10 = vcmp.lt.s32.totalorder %v1488_v50, 1500 }
 0x1d3   : >> { %vm1538_vm12 = vcmp.lt.s32.totalorder %v3811_v35, 1500  ;;  %vm1522_vm14 = vcmp.lt.s32.totalorder %v3815_v28, 1500  ;;  %v1510_v27 = vadd.s32 %v3607_v8, %v4769_v12  ;;  %v3832_v40 = vadd.s32 %v3607_v8, %v4770_v63  ;;  %v4777_v12 = vld [vmem:[#allocation53_spill] sm:$0xff]  ;;  %v4778_v63 = vld [vmem:[#allocation36_spill] sm:$0xff] }
 0x1d4   : >> { %v1841_v17 = vsel %vm1820_vm11, %v1776_v20, %v1808_v37  ;;  %v2483_v53 = vpop.eup %2482  ;;  %v4771_v37 = vld [vmem:[#allocation62_spill] sm:$0xff]  ;;  %v3856_v38 = vsel %vm1520_vm10, %v2481_v47, -1.0  ;;  %v3867_v5 = vadd.s32 %v3607_v8, %v4777_v12  ;;  %v3871_v50 = vadd.s32 %v3607_v8, %v4778_v63 }
 0x1d5   : >> { %v3807_v18 = vsel %vm4572_vm13, %v1841_v17, %v2185_v3  ;;  %v3838_v52 = vadd.s32 %v3607_v8, %v4771_v37  ;;  %v3853_v17 = vsel %vm1521_vm15, %v2479_v6, -1.0  ;;  %vm1542_vm3 = vcmp.lt.s32.totalorder %v1510_v27, 1500  ;;  %v4779_v47 = vld [vmem:[#allocation30_spill] sm:$0xff]  ;;  %v4782_v27 = vld [vmem:[#allocation29_spill] sm:$0xff] }
 0x1d6   : >> { %v972_v4 = vpop.xlane.xlu0 %971  ;;  %v987_v15 = vpop.xlane.xlu1 %986  ;;  %vm1525_vm7 = vcmp.lt.s32.totalorder %v3832_v40, 1500  ;;  %v3894_v63 = vsel %vm1539_vm0, %v2483_v53, -1.0  ;;  %vm1529_vm13 = vcmp.lt.s32.totalorder %v3871_v50, 1500  ;;  %v4789_v49 = vpack.i.bf16 %v3720_v61, %v3693_v24 }
 0x1d7   : >> { %2494 = vrcp.f32 %v972_v4  ;;  %v3846_v4 = vadd.s32 %v3607_v8, %v4773_v32  ;;  %v2485_v58 = vpop.eup %2484  ;;  %vm1545_vm4 = vcmp.lt.s32.totalorder %v3838_v52, 1500 }
 0x1d8   : >> { %2496 = vrcp.f32 %v987_v15  ;;  %v4774_v15 = vld [vmem:[#allocation33_spill] sm:$0xff] }
 0x1d9   : >> { %2498 = vrcp.f32 %v927_v10  ;;  %v3823_v10 = vadd.s32 %v3607_v8, %v4767_v41  ;;  %v3850_v3 = vadd.s32 %v3607_v8, %v4774_v15  ;;  %v4776_v41 = vld [vmem:[#allocation41_spill] sm:$0xff]  ;;  %vm1527_vm5 = vcmp.lt.s32.totalorder %v3846_v4, 1500 }
 0x1da   : >> { %2500 = vrcp.f32 %v981_v62  ;;  %v924_v48 = vpop.xlane.xlu0 %923  ;;  %v939_v14 = vpop.xlane.xlu1 %938  ;;  %v4768_v62 = vld [vmem:[#allocation58_spill] sm:$0xff] }
 0x1db   : >> { %2502 = vrcp.f32 %v924_v48  ;;  %v1511_v33 = vadd.s32 %v3607_v8, %v4768_v62  ;;  %v1515_v48 = vadd.s32 %v3607_v8, %v4775_v51  ;;  %v1499_v62 = vadd.s32 %v3607_v8, %v4776_v41  ;;  %v4780_v51 = vld [vmem:[#allocation35_spill] sm:$0xff] }
 0x1dc   : >> { %2504 = vrcp.f32 %v939_v14  ;;  %v3860_v14 = vpop.eup %2486  ;;  %vm1541_vm1 = vcmp.lt.s32.totalorder %v3823_v10, 1500  ;;  %vm1526_vm6 = vcmp.lt.s32.totalorder %v3850_v3, 1500  ;;  %v3890_v41 = vadd.s32 %v3607_v8, %v4780_v51 }
 0x1dd   : >> { %2506 = vrcp.f32 %v3657_v44  ;;  %v3842_v44 = vadd.s32 %v3607_v8, %v4772_v57  ;;  %v2489_v6 = vpop.eup %2488  ;;  %vm1543_vm2 = vcmp.lt.s32.totalorder %v1511_v33, 1500  ;;  %v3879_v57 = vpack.c.bf16 %v3853_v17, %v3856_v38 }
 0x1de   : >> { %v978_v1 = vpop.xlane.xlu0 %977  ;;  %v3834_v20 = vpop.xlane.xlu1 %1303  ;;  %vm1547_vm8 = vcmp.lt.s32.totalorder %v1515_v48, 1500  ;;  %vm1531_vm10 = vcmp.lt.s32.totalorder %v1499_v62, 1500  ;;  %v3903_v7 = vsel %vm1538_vm12, %v2489_v6, -1.0  ;;  %v4784_v48 = vld [vmem:[#allocation40_spill] sm:$0xff] }
 0x1df   : >> { %2508 = vrcp.f32 %v978_v1  ;;  %v3875_v1 = vadd.s32 %v3607_v8, %v4779_v47  ;;  %vm1544_vm15 = vcmp.lt.s32.totalorder %v3842_v44, 1500  ;;  %v4781_v47 = vld [vmem:[#allocation63_spill] sm:$0xff]  ;;  %v1761_v6 = vunpack.c.h.bf16 %v3879_v57 }
 0x1e0   : >> { %2510 = vrcp.f32 %v933_v54  ;;  %v2491_v54 = vpop.eup %2490  ;;  %v3898_v46 = vadd.s32 %v3607_v8, %v4781_v47  ;;  %v3914_v47 = vsel %vm1523_vm9, %v2485_v58, -1.0 }
 0x1e1   : >> { %v2493_v15 = vpop.eup %2492  ;;  %v3907_v51 = vsel %vm1543_vm2, %v2491_v54, -1.0  ;;  %v4783_v54 = vld [vmem:[#allocation39_spill] sm:$0xff]  ;;  %vm1528_vm2 = vcmp.lt.s32.totalorder %v3890_v41, 1500  ;;  %v1793_v36 = vsub.f32 %v3853_v17, %v1761_v6 }
 0x1e2   : >> { %v930_v37 = vpop.xlane.xlu0 %929  ;;  %v3881_v32 = vpop.xlane.xlu1 %1354  ;;  %v3929_v25 = vsel %vm1522_vm14, %v2493_v15, -1.0  ;;  %v4579_v15 = vmov 1.0   ;;  %vm1546_vm14 = vcmp.lt.s32.totalorder %v3898_v46, 1500 }
 0x1e3   : >> { %2512 = vrcp.f32 %v930_v37  ;;  %v1777_v37 = vunpack.c.h.bf16 %v3759_v42  ;;  %v1760_v42 = vunpack.c.l.bf16 %v3879_v57  ;;  %v3937_v57 = vadd.s32 %v3607_v8, %v4784_v48 }
 0x1e4   : >> { %v2495_v12 = vpop.eup %2494  ;;  %v3968_v3 = vpack.c.bf16 %v3914_v47, %v3929_v25 }
 0x1e5   : >> { %v2497_v59 = vpop.eup %2496  ;;  %v3910_v21 = vsel %vm1542_vm3, %v2495_v12, -1.0  ;;  %v1809_v28 = vsub.f32 %v3735_v31, %v1777_v37 }
 0x1e6   : >> { %v2499_v53 = vpop.eup %2498  ;;  %v984_v30 = vpop.xlane.xlu0 %983  ;;  %v3918_v35 = vsel %vm1547_vm8, %v2497_v59, -1.0  ;;  %v3933_v59 = vpack.c.bf16 %v3894_v63, %v3903_v7  ;;  %v4794_v41 = vunpack.c.l.bf16 %v3968_v3 }
 0x1e7   : >> { %v3921_v0 = vpop.xlane.xlu1 %1306  ;;  %v2501_v33 = vpop.eup %2500  ;;  %2514 = vrcp.f32 %v984_v30  ;;  %vm1611_vm0 = vcmp.gt.f32.partialorder %v3918_v35, %v4782_v27  ;;  %vm1643_vm12 = vcmp.le.f32.partialorder %v3918_v35, %v4783_v54  ;;  %v3942_v30 = vpack.c.bf16 %v3907_v51, %v3910_v21 }
 0x1e8   : >> { %v2503_v58 = vpop.eup %2502  ;;  %vm1675_vm9 = vmand %vm1611_vm0, %vm1643_vm12  ;;  %2516 = vrcp.f32 %v3745_v13  ;;  %v3949_v16 = vsel %vm1527_vm5, %v2499_v53, -1.0  ;;  %v1792_v13 = vsub.f32 %v3856_v38, %v1760_v42  ;;  %v3982_v62 = vsel %vm1545_vm4, %v2501_v33, -1.0 }
 0x1e9   : >> { %4785 = vst [vmem:[#allocation105_spill] sm:$0xff] %v3942_v30  ;;  %v2505_v12 = vpop.eup %2504  ;;  %2263 = vmatprep.subr.msk.mxu0 %vm1675_vm9, %v4579_v15  ;;  %v3953_v8 = vsel %vm1526_vm6, %v2503_v58, -1.0  ;;  %v1783_v53 = vunpack.c.h.bf16 %v3942_v30  ;;  %v3991_v10 = vsel %vm1820_vm11, %v1777_v37, %v1809_v28  ;;  %v4007_v37 = vsel %vm1820_vm11, %v1761_v6, %v1793_v36 }
 0x1ea   : >> { %v2507_v48 = vpop.eup %2506  ;;  %v936_v19 = vpop.xlane.xlu0 %935  ;;  %2358 = vxpose.xlu0.b32.start [1/16] (narrow) %v4786_v23, 8  ;;  %v3961_v15 = vsel %vm1531_vm10, %v2505_v12, -1.0  ;;  %v3977_v23 = vsel %vm1541_vm1, %v3860_v14, -1.0  ;;  %v4788_v14 = vmov 1.0   ;;  %vm1530_vm1 = vcmp.lt.s32.totalorder %v3937_v57, 1500 }
 0x1eb   : >> { %v3964_v4 = vpop.xlane.xlu1 %1357  ;;  %2518 = vrcp.f32 %v936_v19  ;;  %vm1595_vm3 = vcmp.gt.f32.partialorder %v3961_v15, %v4782_v27  ;;  %vm1627_vm5 = vcmp.le.f32.partialorder %v3961_v15, %v4783_v54  ;;  %v3986_v19 = vpack.c.bf16 %v3949_v16, %v3953_v8 }
 0x1ec   : >> { %v2509_v26 = vpop.eup %2508  ;;  %vm1659_vm6 = vmand %vm1595_vm3, %vm1627_vm5  ;;  %2520 = vrcp.f32 %v3780_v9  ;;  %v4000_v52 = vsel %vm1525_vm7, %v2507_v48, -1.0  ;;  %v1825_v9 = vsel %vm1820_vm11, %v1760_v42, %v1792_v13  ;;  %v1815_v48 = vsub.f32 %v3907_v51, %v1783_v53 }
 0x1ed   : >> { %4787 = vst [vmem:[#allocation106_spill] sm:$0xff] %v3986_v19  ;;  %v2511_v58 = vpop.eup %2510  ;;  %2264 = vmatpush3.msk.msra.mxu0 %vm1659_vm6, %v4788_v14  ;;  %v3996_v12 = vsel %vm1544_vm15, %v2509_v26, -1.0  ;;  %v1767_v24 = vunpack.c.h.bf16 %v3986_v19  ;;  %v4790_v36 = vmov 0.0   ;;  %v4791_v13 = vunpack.c.l.bf16 %v3933_v59 }
 0x1ee   : >> { %v1130_v33 = vpop.xlane.xlu0 %1129  ;;  %2360 = vxpose.xlu0.b32.cont [2/16] (narrow) %v4789_v49, 8  ;;  %v1754_v61 = vpack.c.bf16 %v3982_v62, %v3996_v12  ;;  %v4027_v49 = vsel %vm1529_vm13, %v2511_v58, -1.0  ;;  %vm4792_vm7 = vcmask 15360   ;;  %v4036_v44 = vsel %vm1820_vm11, %v1783_v53, %v1815_v48 }
 0x1ef   : >> { %v4011_v28 = vpop.xlane.xlu1 %1309  ;;  %vm1390_vm4 = vcmp.eq.f32.partialorder %v1130_v33, %v3834_v20  ;;  %v4023_v26 = vsub.f32 %v3903_v7, %v4791_v13  ;;  %v1799_v19 = vsub.f32 %v3949_v16, %v1767_v24  ;;  %v4793_v13 = vpack.i.bf16 %v3771_v39, %v3749_v2 }
 0x1f0   : >> { %v2513_v42 = vpop.eup %2512  ;;  %v2169_v6 = vsel %vm1390_vm4, 1.0, %v4790_v36  ;;  %vm1609_vm13 = vcmp.gt.f32.partialorder %v3982_v62, %v4782_v27  ;;  %vm1641_vm8 = vcmp.le.f32.partialorder %v3982_v62, %v4783_v54  ;;  %v4050_v53 = vsub.f32 %v3929_v25, %v4794_v41 }
 0x1f1   : >> { %v1858_v33 = vsel %vm4792_vm7, %v1825_v9, %v2169_v6  ;;  %v4033_v40 = vsel %vm1528_vm2, %v2513_v42, -1.0  ;;  %vm1540_vm15 = vcmp.lt.s32.totalorder %v3867_v5, 1500  ;;  %v4057_v2 = vsel %vm1820_vm11, %v1767_v24, %v1799_v19 }
 0x1f2   : >> { %v1181_v30 = vpop.xlane.xlu0 %1180  ;;  %2362 = vxpose.xlu0.b32.cont [3/16] (narrow) %v4793_v13, 8  ;;  %v2365_v50 = vpack.i.bf16 %v1858_v33, %v3807_v18  ;;  %v1784_v39 = vunpack.c.l.bf16 %v1754_v61  ;;  %v1746_v18 = vpack.c.bf16 %v4027_v49, %v4033_v40  ;;  %vm1593_vm0 = vcmp.gt.f32.partialorder %v4027_v49, %v4782_v27 }
 0x1f3   : >> { %v4052_v58 = vpop.xlane.xlu1 %1360  ;;  %vm1407_vm10 = vcmp.eq.f32.partialorder %v1181_v30, %v3881_v32  ;;  %vm1625_vm12 = vcmp.le.f32.partialorder %v4027_v49, %v4783_v54  ;;  %vm1608_vm9 = vcmp.gt.f32.partialorder %v3996_v12, %v4782_v27  ;;  %v1785_v48 = vunpack.c.h.bf16 %v1754_v61 }
 0x1f4   : >> { %v2515_v9 = vpop.eup %2514  ;;  %v2186_v32 = vsel %vm1407_vm10, 1.0, %v4790_v36  ;;  %vm1639_vm3 = vcmp.le.f32.partialorder %v3907_v51, %v4783_v54  ;;  %v1816_v19 = vsub.f32 %v3996_v12, %v1784_v39  ;;  %v1768_v24 = vunpack.c.l.bf16 %v1746_v18 }
 0x1f5   : >> { %v1578_v30 = vsel %vm1546_vm14, %v2515_v9, -1.0  ;;  %v2517_v42 = vpop.eup %2516  ;;  %v4795_v33 = vpack.i.bf16 %v3774_v45, %v3777_v34  ;;  %vm1623_vm4 = vcmp.le.f32.partialorder %v3949_v16, %v4783_v54  ;;  %v1817_v61 = vsub.f32 %v3982_v62, %v1785_v48 }
 0x1f6   : >> { %v1133_v6 = vpop.xlane.xlu0 %1132  ;;  %vm1610_vm5 = vcmp.gt.f32.partialorder %v1578_v30, %v4782_v27  ;;  %vm1642_vm6 = vcmp.le.f32.partialorder %v1578_v30, %v4783_v54  ;;  %v1769_v13 = vunpack.c.h.bf16 %v1746_v18  ;;  %v4090_v45 = vsel %vm1820_vm11, %v1784_v39, %v1816_v19 }
 0x1f7   : >> { %2364 = vxpose.xlu0.b32.cont [4/16] (narrow) %v4795_v33, 8  ;;  %v4084_v46 = vpop.xlane.xlu1 %1312  ;;  %vm1391_vm10 = vcmp.eq.f32.partialorder %v1133_v6, %v3921_v0  ;;  %vm1674_vm2 = vmand %vm1610_vm5, %vm1642_vm6  ;;  %v1800_v34 = vsub.f32 %v4033_v40, %v1768_v24  ;;  %v1755_v41 = vpack.c.bf16 %v3918_v35, %v1578_v30  ;;  %vm1640_vm7 = vcmp.le.f32.partialorder %v3996_v12, %v4783_v54 }
 0x1f8   : >> { %v2519_v9 = vpop.eup %2518  ;;  %v2170_v33 = vsel %vm1391_vm10, 1.0, %v4790_v36  ;;  %2265 = vmatprep.subr.msk.mxu0 %vm1674_vm2, %v4788_v14  ;;  %v4099_v18 = vsel %vm1820_vm11, %v1785_v48, %v1817_v61  ;;  %v1801_v0 = vsub.f32 %v4027_v49, %v1769_v13  ;;  %vm4797_vm5 = vcmask 15360   ;;  %vm1673_vm6 = vmand %vm1609_vm13, %vm1641_vm8 }
 0x1f9   : >> { %4796 = vst [vmem:[#allocation107_spill] sm:$0xff] %v4099_v18  ;;  %v1859_v39 = vsel %vm4797_vm5, %v4007_v37, %v2170_v33  ;;  %v1562_v19 = vsel %vm1530_vm1, %v2519_v9, -1.0  ;;  %v4111_v6 = vsel %vm1820_vm11, %v1768_v24, %v1800_v34  ;;  %v1786_v20 = vunpack.c.l.bf16 %v1755_v41  ;;  %v2521_v48 = vpop.eup %2520  ;;  %vm4798_vm10 = vmmov %vm4797_vm5 }
 0x1fa   : >> { %v1875_v61 = vsel %vm4798_vm10, %v3991_v10, %v2186_v32  ;;  %v1184_v18 = vpop.xlane.xlu0 %1183  ;;  %vm1594_vm5 = vcmp.gt.f32.partialorder %v1562_v19, %v4782_v27  ;;  %vm1626_vm1 = vcmp.le.f32.partialorder %v1562_v19, %v4783_v54  ;;  %vm1621_vm2 = vcmp.le.f32.partialorder %v4000_v52, %v4783_v54  ;;  %vm1672_vm13 = vmand %vm1608_vm9, %vm1640_vm7 }
 0x1fb   : >> { %2366 = vxpose.xlu0.b32.cont [5/16] (narrow) %v2365_v50, 8  ;;  %v4121_v57 = vpop.xlane.xlu1 %1363  ;;  %v4124_v37 = vsel %vm1820_vm11, %v1769_v13, %v1801_v0  ;;  %vm1408_vm14 = vcmp.eq.f32.partialorder %v1184_v18, %v3964_v4  ;;  %vm1658_vm10 = vmand %vm1594_vm5, %vm1626_vm1  ;;  %v1818_v10 = vsub.f32 %v1578_v30, %v1786_v20  ;;  %v1747_v50 = vpack.c.bf16 %v3961_v15, %v1562_v19 }
 0x1fc   : >> { %v1787_v32 = vunpack.c.h.bf16 %v1755_v41  ;;  %v4799_v24 = vunpack.c.l.bf16 %v3933_v59  ;;  %2266 = vmatpush3.msk.msra.mxu0 %vm1658_vm10, %v4788_v14  ;;  %v2367_v13 = vpack.i.bf16 %v1859_v39, %v1875_v61  ;;  %vm1592_vm5 = vcmp.gt.f32.partialorder %v4033_v40, %v4782_v27  ;;  %vm1657_vm10 = vmand %vm1593_vm0, %vm1625_vm12 }
 0x1fd   : >> { %vm1624_vm1 = vcmp.le.f32.partialorder %v4033_v40, %v4783_v54  ;;  %2267 = vmatprep.subr.msk.mxu0 %vm1673_vm6, %v4788_v14  ;;  %v4152_v62 = vsel %vm1540_vm15, %v2517_v42, -1.0  ;;  %v1770_v30 = vunpack.c.l.bf16 %v1747_v50  ;;  %v2187_v9 = vsel %vm1408_vm14, 1.0, %v4790_v36 }
 0x1fe   : >> { %v1843_v34 = vsel %vm1820_vm11, %v4799_v24, %v4023_v26  ;;  %v4155_v26 = vsel %vm1820_vm11, %v1786_v20, %v1818_v10  ;;  %v1819_v41 = vsub.f32 %v3918_v35, %v1787_v32  ;;  %v1136_v33 = vpop.xlane.xlu0 %1135  ;;  %2268 = vmatpush3.msk.msra.mxu0 %vm1657_vm10, %v4788_v14  ;;  %v4800_v49 = vunpack.c.l.bf16 %v3968_v3  ;;  %vm1656_vm0 = vmand %vm1592_vm5, %vm1624_vm1 }
 0x1ff   : >> { %2368 = vxpose.xlu0.b32.cont [6/16] (narrow) %v2367_v13, 8  ;;  %vm1606_vm8 = vcmp.gt.f32.partialorder %v3910_v21, %v4782_v27  ;;  %v4174_v35 = vpop.xlane.xlu1 %1315  ;;  %v1771_v4 = vunpack.c.h.bf16 %v1747_v50  ;;  %vm1392_vm15 = vcmp.eq.f32.partialorder %v1136_v33, %v4011_v28  ;;  %2269 = vmatprep.subr.msk.mxu0 %vm1672_vm13, %v4788_v14  ;;  %vm1638_vm12 = vcmp.le.f32.partialorder %v3910_v21, %v4783_v54 }
 0x200   : >> { %v1827_v5 = vsel %vm1820_vm11, %v4800_v49, %v4050_v53  ;;  %v1802_v12 = vsub.f32 %v1562_v19, %v1770_v30  ;;  %v4187_v20 = vsel %vm1820_vm11, %v1787_v32, %v1819_v41  ;;  %v2171_v53 = vsel %vm1392_vm15, 1.0, %v4790_v36  ;;  %2270 = vmatpush3.msk.msra.mxu0 %vm1656_vm0, %v4788_v14 }
 0x201   : >> { %vm4801_vm9 = vcmp.gt.f32.partialorder %v3907_v51, %v4782_v27  ;;  %vm1590_vm7 = vcmp.gt.f32.partialorder %v3953_v8, %v4782_v27  ;;  %vm1622_vm6 = vcmp.le.f32.partialorder %v3953_v8, %v4783_v54  ;;  %v1803_v28 = vsub.f32 %v3961_v15, %v1771_v4 }
 0x202   : >> { %vm1671_vm14 = vmand %vm4801_vm9, %vm1639_vm3  ;;  %vm4802_vm5 = vcmask 15360   ;;  %vm4804_vm3 = vcmp.gt.f32.partialorder %v3949_v16, %v4782_v27  ;;  %vm4805_vm13 = vcmp.lt.s32.totalorder %v3875_v1, 1500  ;;  %v4216_v18 = vsel %vm1820_vm11, %v1770_v30, %v1802_v12  ;;  %v1187_v15 = vpop.xlane.xlu0 %1186 }
 0x203   : >> { %v1876_v40 = vsel %vm4802_vm5, %v1843_v34, %v2187_v9  ;;  %vm4803_vm1 = vmmov %vm4802_vm5  ;;  %2271 = vmatprep.subr.msk.mxu0 %vm1671_vm14, %v4788_v14  ;;  %v4213_v51 = vsel %vm4805_vm13, %v2521_v48, -1.0  ;;  %v4806_v0 = vunpack.c.h.bf16 %v3933_v59  ;;  %v4807_v1 = vunpack.c.h.bf16 %v3968_v3  ;;  %v4231_v48 = vpop.xlane.xlu1 %1366 }
 0x204   : >> { %v1860_v42 = vsel %vm4803_vm1, %v1827_v5, %v2171_v53  ;;  %vm1655_vm10 = vmand %vm4804_vm3, %vm1623_vm4  ;;  %v4234_v61 = vsel %vm1820_vm11, %v1771_v4, %v1803_v28  ;;  %vm1409_vm15 = vcmp.eq.f32.partialorder %v1187_v15, %v4052_v58  ;;  %vm1604_vm0 = vcmp.gt.f32.partialorder %v4152_v62, %v4782_v27 }
 0x205   : >> { %2272 = vmatpush3.msk.msra.mxu0 %vm1655_vm10, %v4788_v14  ;;  %v1811_v39 = vsub.f32 %v3894_v63, %v4806_v0  ;;  %vm1670_vm4 = vmand %vm1606_vm8, %vm1638_vm12  ;;  %v2369_v16 = vpack.i.bf16 %v1860_v42, %v1876_v40  ;;  %v1795_v19 = vsub.f32 %v3914_v47, %v4807_v1  ;;  %vm1636_vm12 = vcmp.le.f32.partialorder %v4152_v62, %v4783_v54 }
 0x206   : >> { %2273 = vmatprep.subr.msk.mxu0 %vm1670_vm4, %v4788_v14  ;;  %vm1654_vm8 = vmand %vm1590_vm7, %vm1622_vm6  ;;  %v4250_v10 = vpack.c.bf16 %v3977_v23, %v4152_v62  ;;  %vm4808_vm9 = vcmp.le.f32.partialorder %v3977_v23, %v4783_v54  ;;  %vm4809_vm14 = vcmp.gt.f32.partialorder %v3977_v23, %v4782_v27  ;;  %vm1588_vm6 = vcmp.gt.f32.partialorder %v4213_v51, %v4782_v27  ;;  %v1139_v24 = vpop.xlane.xlu0 %1138 }
 0x207   : >> { %2274 = vmatpush3.msk.msra.mxu0 %vm1654_vm8, %v4788_v14  ;;  %2370 = vxpose.xlu0.b32.cont [7/16] (narrow) %v2369_v16, 8  ;;  %vm1669_vm7 = vmand %vm4809_vm14, %vm4808_vm9  ;;  %vm1620_vm5 = vcmp.le.f32.partialorder %v4213_v51, %v4783_v54  ;;  %v4265_v50 = vpack.c.bf16 %v4000_v52, %v4213_v51  ;;  %vm4810_vm1 = vcmp.gt.f32.partialorder %v4000_v52, %v4782_v27  ;;  %v2188_v32 = vsel %vm1409_vm15, 1.0, %v4790_v36  ;;  %v4296_v58 = vpop.xlane.xlu1 %1318 }
 0x208   : >> { %2275 = vmatprep.subr.msk.mxu0 %vm1669_vm7, %v4788_v14  ;;  %vm1653_vm3 = vmand %vm4810_vm1, %vm1621_vm2  ;;  %vm1603_vm10 = vcmp.gt.f32.partialorder %v3894_v63, %v4782_v27  ;;  %vm1635_vm13 = vcmp.le.f32.partialorder %v3894_v63, %v4783_v54  ;;  %vm1587_vm4 = vcmp.gt.f32.partialorder %v3914_v47, %v4782_v27  ;;  %vm1619_vm8 = vcmp.le.f32.partialorder %v3914_v47, %v4783_v54 }
 0x209   : >> { %2276 = vmatpush3.msk.msra.mxu0 %vm1653_vm3, %v4788_v14  ;;  %vm1668_vm2 = vmand %vm1604_vm0, %vm1636_vm12  ;;  %vm1602_vm9 = vcmp.gt.f32.partialorder %v3903_v7, %v4782_v27  ;;  %vm1634_vm14 = vcmp.le.f32.partialorder %v3903_v7, %v4783_v54  ;;  %v4811_v34 = vmov %v4806_v0  ;;  %v4812_v30 = vmov %v4807_v1 }
 0x20a   : >> { %v1844_v13 = vsel %vm1820_vm11, %v4811_v34, %v1811_v39  ;;  %v1828_v41 = vsel %vm1820_vm11, %v4812_v30, %v1795_v19  ;;  %vm1393_vm15 = vcmp.eq.f32.partialorder %v1139_v24, %v4084_v46  ;;  %2277 = vmatprep.subr.msk.mxu0 %vm1668_vm2, %v4788_v14  ;;  %vm1652_vm0 = vmand %vm1588_vm6, %vm1620_vm5  ;;  %vm1586_vm12 = vcmp.gt.f32.partialorder %v3929_v25, %v4782_v27  ;;  %v1190_v63 = vpop.xlane.xlu0 %1189  ;;  %v4820_v39 = vld [vmem:[#allocation106_spill] sm:$0xff] }
 0x20b   : >> { %v2172_v59 = vsel %vm1393_vm15, 1.0, %v4790_v36  ;;  %2278 = vmatpush3.msk.msra.mxu0 %vm1652_vm0, %v4788_v14  ;;  %vm1667_vm7 = vmand %vm1603_vm10, %vm1635_vm13  ;;  %v1780_v3 = vunpack.c.l.bf16 %v4250_v10  ;;  %vm1618_vm1 = vcmp.le.f32.partialorder %v3929_v25, %v4783_v54  ;;  %v1764_v46 = vunpack.c.l.bf16 %v4265_v50  ;;  %v4350_v47 = vpop.xlane.xlu1 %1369 }
 0x20c   : >> { %vm4813_vm6 = vcmask 15360   ;;  %2279 = vmatprep.subr.msk.mxu0 %vm1667_vm7, %v4788_v14  ;;  %vm1651_vm3 = vmand %vm1587_vm4, %vm1619_vm8  ;;  %vm1601_vm10 = vcmp.gt.f32.partialorder %v3735_v31, %v4782_v27  ;;  %vm1633_vm13 = vcmp.le.f32.partialorder %v3735_v31, %v4783_v54  ;;  %vm1585_vm4 = vcmp.gt.f32.partialorder %v3853_v17, %v4782_v27 }
 0x20d   : >> { %v1877_v9 = vsel %vm4813_vm6, %v1844_v13, %v2188_v32  ;;  %vm4814_vm5 = vmmov %vm4813_vm6  ;;  %2280 = vmatpush3.msk.msra.mxu0 %vm1651_vm3, %v4788_v14  ;;  %vm1617_vm8 = vcmp.le.f32.partialorder %v3853_v17, %v4783_v54  ;;  %vm1410_vm15 = vcmp.eq.f32.partialorder %v1190_v63, %v4121_v57  ;;  %vm1632_vm0 = vcmp.le.f32.partialorder %v3740_v22, %v4783_v54 }
 0x20e   : >> { %v1861_v33 = vsel %vm4814_vm5, %v1828_v41, %v2172_v59  ;;  %vm1666_vm2 = vmand %vm1602_vm9, %vm1634_vm14  ;;  %vm1600_vm14 = vcmp.gt.f32.partialorder %v3740_v22, %v4782_v27  ;;  %vm1584_vm7 = vcmp.gt.f32.partialorder %v3856_v38, %v4782_v27  ;;  %v1812_v7 = vsub.f32 %v4152_v62, %v1780_v3  ;;  %v1142_v62 = vpop.xlane.xlu0 %1141 }
 0x20f   : >> { %v2371_v49 = vpack.i.bf16 %v1861_v33, %v1877_v9  ;;  %2281 = vmatprep.subr.msk.mxu0 %vm1666_vm2, %v4788_v14  ;;  %vm1650_vm9 = vmand %vm1586_vm12, %vm1618_vm1  ;;  %v1796_v25 = vsub.f32 %v4213_v51, %v1764_v46  ;;  %vm1616_vm1 = vcmp.le.f32.partialorder %v3856_v38, %v4783_v54  ;;  %vm1599_vm5 = vcmp.gt.f32.partialorder %v3688_v56, %v4782_v27  ;;  %v4406_v17 = vpop.xlane.xlu1 %1321 }
 0x210   : >> { %2282 = vmatpush3.msk.msra.mxu0 %vm1650_vm9, %v4788_v14  ;;  %vm1665_vm12 = vmand %vm1601_vm10, %vm1633_vm13  ;;  %vm1631_vm3 = vcmp.le.f32.partialorder %v3688_v56, %v4783_v54  ;;  %vm1583_vm10 = vcmp.gt.f32.partialorder %v3709_v55, %v4782_v27  ;;  %v2189_v31 = vsel %vm1410_vm15, 1.0, %v4790_v36  ;;  %vm1615_vm2 = vcmp.le.f32.partialorder %v3709_v55, %v4783_v54 }
 0x211   : >> { %2372 = vxpose.xlu0.b32.cont [8/16] (narrow) %v2371_v49, 8  ;;  %2283 = vmatprep.subr.msk.mxu0 %vm1665_vm12, %v4788_v14  ;;  %vm1649_vm6 = vmand %vm1585_vm4, %vm1617_vm8  ;;  %vm1598_vm4 = vcmp.gt.f32.partialorder %v3681_v60, %v4782_v27  ;;  %vm1630_vm8 = vcmp.le.f32.partialorder %v3681_v60, %v4783_v54  ;;  %vm1394_vm15 = vcmp.eq.f32.partialorder %v1142_v62, %v4174_v35  ;;  %v1781_v22 = vunpack.c.h.bf16 %v4250_v10  ;;  %v4817_v60 = vld [vmem:[#allocation103_spill] sm:$0xff] }
 0x212   : >> { %2284 = vmatpush3.msk.msra.mxu0 %vm1649_vm6, %v4788_v14  ;;  %vm1664_vm13 = vmand %vm1600_vm14, %vm1632_vm0  ;;  %vm1582_vm14 = vcmp.gt.f32.partialorder %v3714_v43, %v4782_v27  ;;  %vm1614_vm0 = vcmp.le.f32.partialorder %v3714_v43, %v4783_v54  ;;  %v1845_v57 = vsel %vm1820_vm11, %v1780_v3, %v1812_v7  ;;  %v1829_v5 = vsel %vm1820_vm11, %v1764_v46, %v1796_v25  ;;  %v1193_v56 = vpop.xlane.xlu0 %1192  ;;  %v4818_v43 = vld [vmem:[#allocation104_spill] sm:$0xff] }
 0x213   : >> { %2285 = vmatprep.subr.msk.mxu0 %vm1664_vm13, %v4788_v14  ;;  %vm1648_vm9 = vmand %vm1584_vm7, %vm1616_vm1  ;;  %v2173_v35 = vsel %vm1394_vm15, 1.0, %v4790_v36  ;;  %v1765_v38 = vunpack.c.h.bf16 %v4265_v50  ;;  %vm4815_vm12 = vcmask 15360   ;;  %vm1597_vm13 = vcmp.gt.f32.partialorder %v3636_v11, %v4782_v27  ;;  %v1373_v55 = vpop.xlane.xlu1 %1372 }
 0x214   : >> { %2286 = vmatpush3.msk.msra.mxu0 %vm1648_vm9, %v4788_v14  ;;  %vm1663_vm7 = vmand %vm1599_vm5, %vm1631_vm3  ;;  %v1878_v4 = vsel %vm4815_vm12, %v1845_v57, %v2189_v31  ;;  %vm1629_vm5 = vcmp.le.f32.partialorder %v3636_v11, %v4783_v54  ;;  %v1813_v28 = vsub.f32 %v3977_v23, %v1781_v22  ;;  %vm1411_vm15 = vcmp.eq.f32.partialorder %v1193_v56, %v4231_v48 }
 0x215   : >> { %vm4816_vm1 = vmmov %vm4815_vm12  ;;  %2287 = vmatprep.subr.msk.mxu0 %vm1663_vm7, %v4788_v14  ;;  %vm1628_vm9 = vcmp.le.f32.partialorder %v4817_v60, %v4783_v54  ;;  %v1797_v23 = vsub.f32 %v4000_v52, %v1765_v38  ;;  %v2190_v11 = vsel %vm1411_vm15, 1.0, %v4790_v36  ;;  %v1766_v16 = vunpack.c.l.bf16 %v4820_v39 }
 0x216   : >> { %v1862_v12 = vsel %vm4816_vm1, %v1829_v5, %v2173_v35  ;;  %vm1647_vm6 = vmand %vm1583_vm10, %vm1615_vm2  ;;  %vm1581_vm10 = vcmp.gt.f32.partialorder %v3649_v29, %v4782_v27  ;;  %vm1613_vm2 = vcmp.le.f32.partialorder %v3649_v29, %v4783_v54  ;;  %v1145_v40 = vpop.xlane.xlu0 %1144  ;;  %v1846_v42 = vsel %vm1820_vm11, %v1781_v22, %v1813_v28  ;;  %v4819_v29 = vld [vmem:[#allocation105_spill] sm:$0xff] }
 0x217   : >> { %2288 = vmatpush3.msk.msra.mxu0 %vm1647_vm6, %v4788_v14  ;;  %vm1662_vm3 = vmand %vm1598_vm4, %vm1630_vm8  ;;  %v2373_v53 = vpack.i.bf16 %v1862_v12, %v1878_v4  ;;  %vm1596_vm8 = vcmp.gt.f32.partialorder %v4817_v60, %v4782_v27  ;;  %v1325_v52 = vpop.xlane.xlu1 %1324  ;;  %vm1395_vm6 = vcmp.eq.f32.partialorder %v1145_v40, %v4296_v58  ;;  %v1830_v51 = vsel %vm1820_vm11, %v1765_v38, %v1797_v23 }
 0x218   : >> { %2289 = vmatprep.subr.msk.mxu0 %vm1662_vm3, %v4788_v14  ;;  %vm1646_vm4 = vmand %vm1582_vm14, %vm1614_vm0  ;;  %vm1580_vm14 = vcmp.gt.f32.partialorder %v4818_v43, %v4782_v27  ;;  %vm1612_vm0 = vcmp.le.f32.partialorder %v4818_v43, %v4783_v54  ;;  %v2174_v15 = vsel %vm1395_vm6, 1.0, %v4790_v36  ;;  %v1782_v0 = vunpack.c.l.bf16 %v4819_v29 }
 0x219   : >> { %2290 = vmatpush3.msk.msra.mxu0 %vm1646_vm4, %v4788_v14  ;;  %2374 = vxpose.xlu0.b32.cont [9/16] (narrow) %v2373_v53, 8  ;;  %vm1661_vm7 = vmand %vm1597_vm13, %vm1629_vm5  ;;  %vm4821_vm5 = vcmask 15360   ;;  %v1798_v24 = vsub.f32 %v3953_v8, %v1766_v16  ;;  %v4829_v53 = vld [vmem:[#allocation107_spill] sm:$0xff] }
 0x21a   : >> { %2291 = vmatprep.subr.msk.mxu0 %vm1661_vm7, %v4788_v14  ;;  %vm1645_vm12 = vmand %vm1581_vm10, %vm1613_vm2  ;;  %v1879_v1 = vsel %vm4821_vm5, %v1846_v42, %v2190_v11  ;;  %v1196_v48 = vpop.xlane.xlu0 %1195  ;;  %v1814_v32 = vsub.f32 %v3910_v21, %v1782_v0 }
 0x21b   : >> { %2292 = vmatpush3.msk.msra.mxu0 %vm1645_vm12, %v4788_v14  ;;  %vm1660_vm1 = vmand %vm1596_vm8, %vm1628_vm9  ;;  %v1376_v50 = vpop.xlane.xlu1 %1375  ;;  %vm1412_vm10 = vcmp.eq.f32.partialorder %v1196_v48, %v4350_v47  ;;  %v1831_v13 = vsel %vm1820_vm11, %v1766_v16, %v1798_v24 }
 0x21c   : >> { %2293 = vmatprep.subr.msk.mxu0 %vm1660_vm1, %v4788_v14  ;;  %vm1644_vm13 = vmand %vm1580_vm14, %vm1612_vm0  ;;  %v1847_v34 = vsel %vm1820_vm11, %v1782_v0, %v1814_v32  ;;  %v4836_v32 = vld [vmem:[#allocation102_spill] sm:$0xff] }
 0x21d   : >> { %2294 = vmatpush3.msk.msra.mxu0 %vm1644_vm13, %v4788_v14  ;;  %vm4822_vm3 = vmmov %vm4821_vm5  ;;  %v2191_v14 = vsel %vm1412_vm10, 1.0, %v4790_v36 }
 0x21e   : >> { %v1863_v19 = vsel %vm4822_vm3, %v1830_v51, %v2174_v15  ;;  %v1148_v58 = vpop.xlane.xlu0 %1147  ;;  %vm4823_vm15 = vmmov %vm4822_vm3 }
 0x21f   : >> { %v2375_v10 = vpack.i.bf16 %v1863_v19, %v1879_v1  ;;  %vm1396_vm2 = vcmp.eq.f32.partialorder %v1148_v58, %v4406_v17  ;;  %v1328_v41 = vpop.xlane.xlu1 %1327  ;;  %v1880_v59 = vsel %vm4823_vm15, %v1847_v34, %v2191_v14  ;;  %vm4824_vm4 = vmmov %vm4822_vm3 }
 0x220   : >> { %v2175_v30 = vsel %vm1396_vm2, 1.0, %v4790_v36  ;;  %vm4825_vm11 = vmmov %vm4822_vm3 }
 0x221   : >> { %2376 = vxpose.xlu0.b32.cont [10/16] (narrow) %v2375_v10, 8  ;;  %v1864_v3 = vsel %vm4824_vm4, %v1831_v13, %v2175_v30  ;;  %vm4826_vm7 = vmmov %vm4822_vm3 }
 0x222   : >> { %v1199_v21 = vpop.xlane.xlu0 %1198  ;;  %v2377_v46 = vpack.i.bf16 %v1864_v3, %v1880_v59  ;;  %vm4827_vm12 = vmmov %vm4822_vm3 }
 0x223   : >> { %vm1413_vm8 = vcmp.eq.f32.partialorder %v1199_v21, %v1373_v55  ;;  %v1379_v33 = vpop.xlane.xlu1 %1378  ;;  %vm4828_vm1 = vmmov %vm4822_vm3 }
 0x224   : >> { %v2192_v8 = vsel %vm1413_vm8, 1.0, %v4790_v36  ;;  %vm4830_vm5 = vmmov %vm4828_vm1 }
 0x225   : >> { %2378 = vxpose.xlu0.b32.cont [11/16] (narrow) %v2377_v46, 8  ;;  %v1881_v49 = vsel %vm4825_vm11, %v4036_v44, %v2192_v8  ;;  %vm4831_vm3 = vmmov %vm4828_vm1 }
 0x226   : >> { %v1151_v9 = vpop.xlane.xlu0 %1150  ;;  %vm4832_vm15 = vmmov %vm4828_vm1 }
 0x227   : >> { %vm1397_vm9 = vcmp.eq.f32.partialorder %v1151_v9, %v1325_v52  ;;  %v1331_v31 = vpop.xlane.xlu1 %1330  ;;  %vm4833_vm4 = vmmov %vm4828_vm1 }
 0x228   : >> { %v2176_v63 = vsel %vm1397_vm9, 1.0, %v4790_v36  ;;  %vm4834_vm11 = vmmov %vm4828_vm1 }
 0x229   : >> { %v1865_v47 = vsel %vm4826_vm7, %v4057_v2, %v2176_v63  ;;  %vm4835_vm7 = vmmov %vm4828_vm1 }
 0x22a   : >> { %v1202_v7 = vpop.xlane.xlu0 %1201  ;;  %v2379_v25 = vpack.i.bf16 %v1865_v47, %v1881_v49 }
 0x22b   : >> { %vm1414_vm14 = vcmp.eq.f32.partialorder %v1202_v7, %v1376_v50  ;;  %v1382_v2 = vpop.xlane.xlu1 %1381 }
 0x22c   : >> { %2380 = vxpose.xlu0.b32.cont [12/16] (narrow) %v2379_v25, 8  ;;  %v2193_v62 = vsel %vm1414_vm14, 1.0, %v4790_v36 }
 0x22d   : >> { %v1882_v57 = vsel %vm4827_vm12, %v4090_v45, %v2193_v62 }
 0x22e   : >> { %v1154_v17 = vpop.xlane.xlu0 %1153 }
 0x22f   : >> { %vm1398_vm0 = vcmp.eq.f32.partialorder %v1154_v17, %v1328_v41  ;;  %v1334_v56 = vpop.xlane.xlu1 %1333 }
 0x230   : >> { %v2177_v22 = vsel %vm1398_vm0, 1.0, %v4790_v36 }
 0x231   : >> { %v1866_v44 = vsel %vm4828_vm1, %v4111_v6, %v2177_v22 }
 0x232   : >> { %v1205_v5 = vpop.xlane.xlu0 %1204  ;;  %v2381_v35 = vpack.i.bf16 %v1866_v44, %v1882_v57 }
 0x233   : >> { %vm1415_vm6 = vcmp.eq.f32.partialorder %v1205_v5, %v1379_v33  ;;  %v1385_v43 = vpop.xlane.xlu1 %1384 }
 0x234   : >> { %2382 = vxpose.xlu0.b32.cont [13/16] (narrow) %v2381_v35, 8  ;;  %v2194_v38 = vsel %vm1415_vm6, 1.0, %v4790_v36 }
 0x235   : >> { %v1883_v55 = vsel %vm4830_vm5, %v4829_v53, %v2194_v38 }
 0x236   : >> { %v1157_v4 = vpop.xlane.xlu0 %1156 }
 0x237   : >> { %vm1399_vm13 = vcmp.eq.f32.partialorder %v1157_v4, %v1331_v31 }
 0x238   : >> { %v2178_v12 = vsel %vm1399_vm13, 1.0, %v4790_v36 }
 0x239   : >> { %v1867_v45 = vsel %vm4831_vm3, %v4124_v37, %v2178_v12  ;;  %v1337_v37 = vpop.xlane.xlu1 %1336 }
 0x23a   : >> { %v1208_v28 = vpop.xlane.xlu0 %1207  ;;  %v2383_v6 = vpack.i.bf16 %v1867_v45, %v1883_v55 }
 0x23b   : >> { %vm1416_vm10 = vcmp.eq.f32.partialorder %v1208_v28, %v1382_v2 }
 0x23c   : >> { %2384 = vxpose.xlu0.b32.cont [14/16] (narrow) %v2383_v6, 8  ;;  %v2195_v60 = vsel %vm1416_vm10, 1.0, %v4790_v36 }
 0x23d   : >> { %v1884_v40 = vsel %vm4832_vm15, %v4155_v26, %v2195_v60 }
 0x23e   : >> { %v1160_v23 = vpop.xlane.xlu0 %1159 }
 0x23f   : >> { %vm1400_vm2 = vcmp.eq.f32.partialorder %v1160_v23, %v1334_v56 }
 0x240   : >> { %v2179_v11 = vsel %vm1400_vm2, 1.0, %v4790_v36 }
 0x241   : >> { %v1868_v52 = vsel %vm4833_vm4, %v4216_v18, %v2179_v11 }
 0x242   : >> { %v1211_v42 = vpop.xlane.xlu0 %1210  ;;  %v2385_v51 = vpack.i.bf16 %v1868_v52, %v1884_v40 }
 0x243   : >> { %vm1417_vm8 = vcmp.eq.f32.partialorder %v1211_v42, %v1385_v43 }
 0x244   : >> { %2386 = vxpose.xlu0.b32.cont [15/16] (narrow) %v2385_v51, 8  ;;  %v2196_v15 = vsel %vm1417_vm8, 1.0, %v4790_v36 }
 0x245   : >> { %v1885_v39 = vsel %vm4834_vm11, %v4187_v20, %v2196_v15 }
 0x246   : >> { %v1163_v29 = vpop.xlane.xlu0 %1162 }
 0x247   : >> { %vm1401_vm9 = vcmp.eq.f32.partialorder %v1163_v29, %v1337_v37 }
 0x248   : >> { %v2180_v0 = vsel %vm1401_vm9, 1.0, %v4790_v36  ;;  %v2021_v36 = vld [vmem:[%s2638_s24] sm:$0x7] (%p660_p10) }
 0x249   : >> { %v1869_v26 = vsel %vm4835_vm7, %v4234_v61, %v2180_v0 }
 0x24a   : >> { %v2387_v16 = vpack.i.bf16 %v1869_v26, %v1885_v39 }
 0x24c   : >> { %2388 = vxpose.xlu0.b32.end [16/16] (narrow) %v2387_v16, 8 }
 0x28c   : >> { %v2389_v18 = vpop.trf.xlu0 }
 0x28d   : >> { %v2393_v1 = vunpack.i.h.bf16 %v2389_v18  ;;  %v2390_v19 = vunpack.i.l.bf16 %v2389_v18 }
 0x28f   : >> { %2014 = vmatprep.mubr.f32.mxu0 %v2390_v19 }
 0x290   : >> { %2015 = vmatmul.mubr.f32.vlgmr.msra.gmra.mxu0 %v2393_v1 }
 0x350   : >> { %v2295_v48 = vpop.f32.mrf.mxu0 }
 0x352   : >> { %v2296_v10 = vpop.f32.mrf.mxu0 }
 0x353   : >> { %v2297_v50 = vadd.f32 %v2296_v10, %v2295_v48  ;;  %662 = sbr.rel (!%p660_p10) target bundleno = 112 (0x70), region = 74 }
 0x355   : >> { %v2020_v24 = vadd.f32 %v4836_v32, %v2297_v50  }
 0x357   : >> { %v4837_v44 = vmov %v2020_v24  ;;  %v2022_v20 = vadd.f32 (%p660_p10), %v2021_v36, %v2020_v24 }
 0x359   : > { %2023 = vst [vmem:[%s2638_s24] sm:$0x7] %v2022_v20 }
 0x35a PF: > { %s12_s13 = sadd.s32 1, %s2570_s13   ;;  %s4838_s9 = smov %s2562_s11 }
 0x35b   : > { %p9_p11 = scmp.ge.s32.totalorder %s12_s13, 6   ;;  %s4839_s10 = smov %s2566_s12 }
 0x35c   : > { %s4840_s11 = smov %s4843_s14  ;;  %s4841_s12 = smov %s4847_s15 }
 0x35d   :  { %11 = sbr.rel (!%p9_p11) target bundleno = 3 (0x3), region = 85 }

</bundles_post_ra>
